<compile_context>
chip_gen: v6e
topology: v6e:2x2x1
jax: 0.10.0
libtpu: 0.0.40
codegen_flags: <defaults>
</compile_context>

<pallas_src>
import functools
import math

import numpy as np
import jax
import jax.numpy as jnp
from jax.experimental import pallas as pl
from jax.experimental.pallas import tpu as pltpu

F32 = jnp.float32
LN_EPS = 1e-6                    # GF_Block: partial(nn.LayerNorm, eps=1e-6)
_INV_SQRT2 = 1.0 / math.sqrt(2.0)

_WEIGHT_ORDER = (
    "ar", "ai", "gcat",
    "ln1_g", "ln1_b", "conv_wt", "conv_b",
    "w1p", "b1p", "w2rp", "w2ip", "b2r", "b2i",
    "ln2_g", "ln2_b", "fc1_wt", "fc1_b", "pool01",
)


# ---------------------------------------------------------------------------
# one-time (outside jit) preparation helpers
# ---------------------------------------------------------------------------
def _block_diag(blocks):                       # (nb, bs, bs) -> (C, C)
    nb, bs, _ = blocks.shape
    out = np.zeros((nb * bs, nb * bs), np.float32)
    for i in range(nb):
        out[i * bs:(i + 1) * bs, i * bs:(i + 1) * bs] = blocks[i]
    return out


def _real_dft_matrices(h, w):
    """Orthonormal real 2-D DFT / iDFT over an (h, w) grid, as dense matrices acting
    on row-major-flattened tokens (n = p*w + q).  Matches torch.fft.rfft2 / irfft2
    (dim=(1, 2), norm='ortho'), including irfft's Hermitian handling of DC/Nyquist
    (their imaginary parts get exactly-zero coefficients in the inverse)."""
    wf = w // 2 + 1
    u = np.arange(h)[:, None, None, None]
    v = np.arange(wf)[None, :, None, None]
    p = np.arange(h)[None, None, :, None]
    q = np.arange(w)[None, None, None, :]
    ph = 2.0 * np.pi * (u * p / h + v * q / w)
    scale = 1.0 / np.sqrt(h * w)
    ar = (scale * np.cos(ph)).reshape(h * wf, h * w)       # Re(X) = ar @ y
    ai = (-scale * np.sin(ph)).reshape(h * wf, h * w)      # Im(X) = ai @ y
    cv = np.full((wf,), 2.0)
    cv[0] = 1.0
    if w % 2 == 0:
        cv[-1] = 1.0                                       # Nyquist counted once
    cuv = np.repeat(cv[None, :], h, axis=0).reshape(h * wf, 1)
    gr = (cuv * ar).T                                      # y = gr @ Re(X) + gi @ Im(X)
    gi = (cuv * ai).T
    return (ar.astype(np.float32), ai.astype(np.float32),
            gr.astype(np.float32), gi.astype(np.float32))


def _pick_batch_tile(B, max_tile=8):
    """Largest divisor of B that is <= max_tile while keeping >= min(4, B) grid steps
    (so the grid feeds both v7x TensorCores and the pipeline has work to overlap)."""
    best = 1
    for d in range(1, min(B, max_tile) + 1):
        if B % d == 0 and (B // d) >= min(4, B):
            best = d
    return best


def prepare_params(params, *, h, w, batch_tile=1, compute_dtype=jnp.bfloat16):
    """Weight prep (numpy, outside jit): densify + 2C-pack the block-diagonal AFNO
    weights, transpose the pointwise matmuls, build the DFT/iDFT and pooling matrices
    (replicated block-diagonally over `batch_tile` images per grid step), cast the
    large matmul weights to bf16."""
    p = {k: np.asarray(jax.device_get(v), np.float32) for k, v in params.items()}
    C = p["ln1_g"].shape[0]
    hidden = p["fc1_w"].shape[0]
    k = hidden // C
    assert hidden == k * C, "AdaptiveAvgPool1d(hidden -> C) assumed evenly divisible"

    w1r, w1i = _block_diag(p["w1"][0]), _block_diag(p["w1"][1])
    w2r, w2i = _block_diag(p["w2"][0]), _block_diag(p["w2"][1])
    # 2C-wide packing (fills the 256-wide v6e/v7x MXU):
    w1p = np.block([[w1r, w1i], [-w1i, w1r]])            # [xr|xi] @ w1p -> [o1r|o1i]
    w2rp = np.concatenate([w2r, -w2i], axis=0)           # [o1r|o1i] @ w2rp -> o2r
    w2ip = np.concatenate([w2i, w2r], axis=0)            # [o2r|o1i] @ w2ip -> o2i
    b1p = np.concatenate([p["b1"][0].reshape(-1), p["b1"][1].reshape(-1)])[None, :]

    ar, ai, gr, gi = _real_dft_matrices(h, w)
    eye = np.eye(batch_tile, dtype=np.float32)
    ar_bb = np.kron(eye, ar)
    ai_bb = np.kron(eye, ai)
    gcat = np.concatenate([np.kron(eye, gr), np.kron(eye, gi)], axis=1)

    pool01 = np.zeros((hidden, C), np.float32)
    pool01[np.arange(hidden), np.arange(hidden) // k] = 1.0   # exact 0/1 in bf16

    cd = compute_dtype
    return dict(
        # static metadata
        bb=int(batch_tile), N=int(h * w), M2=int(h * (w // 2 + 1)),
        C=int(C), hidden=int(hidden), inv_k=float(1.0 / k),
        # f32 small operands (LN params, biases, DFT matrices)
        ar=jnp.asarray(ar_bb, F32), ai=jnp.asarray(ai_bb, F32),
        gcat=jnp.asarray(gcat, F32),
        ln1_g=jnp.asarray(p["ln1_g"][None, :], F32),
        ln1_b=jnp.asarray(p["ln1_b"][None, :], F32),
        ln2_g=jnp.asarray(p["ln2_g"][None, :], F32),
        ln2_b=jnp.asarray(p["ln2_b"][None, :], F32),
        conv_b=jnp.asarray(p["conv_b"][None, :], F32),
        b1p=jnp.asarray(b1p, F32),
        b2r=jnp.asarray(p["b2"][0].reshape(1, C), F32),
        b2i=jnp.asarray(p["b2"][1].reshape(1, C), F32),
        fc1_b=jnp.asarray(p["fc1_b"][None, :], F32),
        # bf16 MXU weights (f32 accumulation in-kernel)
        conv_wt=jnp.asarray(p["conv_w"].T, cd),
        w1p=jnp.asarray(w1p, cd),
        w2rp=jnp.asarray(w2rp, cd),
        w2ip=jnp.asarray(w2ip, cd),
        fc1_wt=jnp.asarray(p["fc1_w"].T, cd),
        pool01=jnp.asarray(pool01, cd),   # 1/k applied in f32 in-kernel (exact average)
    )


# ---------------------------------------------------------------------------
# the fused FourierNetBlock kernel (one batch-tile per grid step)
# ---------------------------------------------------------------------------
def _fourier_block_kernel(x_ref, ar_ref, ai_ref, gcat_ref,
                          ln1g_ref, ln1b_ref, convw_ref, convb_ref,
                          w1p_ref, b1p_ref, w2rp_ref, w2ip_ref, b2r_ref, b2i_ref,
                          ln2g_ref, ln2b_ref, fc1w_ref, fc1b_ref, pool_ref,
                          out_ref, *, inv_k, gelu_exact):
    cd = convw_ref.dtype                                      # bf16 compute dtype
    C = x_ref.shape[-1]
    x = x_ref[...]                                            # (bb*N, C) f32

    # ---- LayerNorm 1 (f32 statistics) ----
    mu1 = jnp.mean(x, axis=-1, keepdims=True)
    var1 = jnp.mean((x - mu1) ** 2, axis=-1, keepdims=True)
    y = (x - mu1) * jax.lax.rsqrt(var1 + LN_EPS) * ln1g_ref[...] + ln1b_ref[...]

    # ---- AFNO bias branch: pointwise Conv1d(kernel=1) == y @ W^T ----
    bias = jnp.dot(y.astype(cd), convw_ref[...],
                   preferred_element_type=F32) + convb_ref[...]

    # ---- forward orthonormal real 2-D DFT as token-axis matmuls (f32, tiny) ----
    xr = jnp.dot(ar_ref[...], y, preferred_element_type=F32)  # (bb*M2, C)
    xi = jnp.dot(ai_ref[...], y, preferred_element_type=F32)

    # ---- AFNO block-diagonal complex MLP, packed into 2C-wide real matmuls ----
    xcat = jnp.concatenate([xr, xi], axis=-1).astype(cd)      # [xr | xi]
    o1 = jnp.maximum(jnp.dot(xcat, w1p_ref[...],
                             preferred_element_type=F32) + b1p_ref[...], 0.0)
    o1_c = o1.astype(cd)                                      # [o1r | o1i]
    o2r = jnp.dot(o1_c, w2rp_ref[...], preferred_element_type=F32) + b2r_ref[...]
    # reference quirk: layer-2 imag part consumes the *updated* real part o2r
    lhs_i = jnp.concatenate([o2r.astype(cd), o1_c[:, C:]], axis=-1)
    o2i = jnp.dot(lhs_i, w2ip_ref[...], preferred_element_type=F32) + b2i_ref[...]

    # ---- inverse orthonormal real 2-D DFT: spat = Gr @ o2r + Gi @ o2i ----
    ospec = jnp.concatenate([o2r, o2i], axis=0)               # (2*bb*M2, C) f32
    spat = jnp.dot(gcat_ref[...], ospec, preferred_element_type=F32)

    # ---- residual 1 ----
    x1 = x + spat + bias

    # ---- LayerNorm 2 ----
    mu2 = jnp.mean(x1, axis=-1, keepdims=True)
    var2 = jnp.mean((x1 - mu2) ** 2, axis=-1, keepdims=True)
    z = (x1 - mu2) * jax.lax.rsqrt(var2 + LN_EPS) * ln2g_ref[...] + ln2b_ref[...]

    # ---- Mlp: fc1 -> GELU -> AdaptiveAvgPool1d(hidden -> C) ----
    hid = jnp.dot(z.astype(cd), fc1w_ref[...],
                  preferred_element_type=F32) + fc1b_ref[...]
    if gelu_exact:
        hid = 0.5 * hid * (1.0 + jax.lax.erf(hid * _INV_SQRT2))  # torch nn.GELU (erf)
    else:
        hid = jax.nn.gelu(hid, approximate=True)  # tanh GELU on the EUP (perf option)
    pooled = jnp.dot(hid.astype(cd), pool_ref[...],
                     preferred_element_type=F32) * inv_k          # 1/k in f32 (exact)

    # ---- residual 2 ----
    out_ref[...] = x1 + pooled


# ---------------------------------------------------------------------------
# pallas_call wrapper
# ---------------------------------------------------------------------------
def _vmem_limit_bytes():
    cap = 128 * 1024 * 1024
    try:
        cap = int(pltpu.get_tpu_info().vmem_capacity_bytes)   # generation-aware
    except Exception:
        pass
    return max(16 * 1024 * 1024, min(64 * 1024 * 1024, int(cap * 0.6)))


def fourier_net_block(x, prep, *, gelu_exact=True):
    """x: (B, N, C) f32 with N == h*w.  Returns (B, N, C) f32."""
    B, N, C = x.shape
    bb = prep["bb"]
    assert N == prep["N"] and C == prep["C"], "prep built for different (h, w, dim)"
    assert B % bb == 0, "batch must be divisible by the prepared batch tile"
    M = B * N
    rows = bb * N

    x2 = x.reshape(M, C).astype(F32)
    row_spec = pl.BlockSpec((rows, C), lambda b: (b, 0))
    const_spec = lambda a: pl.BlockSpec(a.shape, lambda b: (0, 0))  # VMEM-resident
    weights = [prep[name] for name in _WEIGHT_ORDER]

    kernel = functools.partial(_fourier_block_kernel,
                               inv_k=prep["inv_k"], gelu_exact=gelu_exact)
    out = pl.pallas_call(
        kernel,
        out_shape=jax.ShapeDtypeStruct((M, C), F32),
        grid=(B // bb,),
        in_specs=[row_spec] + [const_spec(a) for a in weights],
        out_specs=row_spec,
        compiler_params=pltpu.CompilerParams(
            dimension_semantics=("parallel",),
            vmem_limit_bytes=_vmem_limit_bytes()),
    )(x2, *weights)
    return out.reshape(B, N, C)


# ---------------------------------------------------------------------------
# deterministic synthetic parameters (shapes match the PyTorch __init__)
# ---------------------------------------------------------------------------
def init_params(key, dim, mlp_ratio=2.0):
    nb = 2
    bs = dim // nb
    hidden = int(dim * mlp_ratio)
    ks = jax.random.split(key, 8)
    scale = 0.02
    return dict(
        ln1_g=jnp.ones((dim,), F32), ln1_b=jnp.zeros((dim,), F32),
        ln2_g=jnp.ones((dim,), F32), ln2_b=jnp.zeros((dim,), F32),
        w1=scale * jax.random.normal(ks[0], (2, nb, bs, bs), F32),
        b1=scale * jax.random.normal(ks[1], (2, nb, bs), F32),
        w2=scale * jax.random.normal(ks[2], (2, nb, bs, bs), F32),
        b2=scale * jax.random.normal(ks[3], (2, nb, bs), F32),
        conv_w=(dim ** -0.5) * jax.random.normal(ks[4], (dim, dim), F32),
        conv_b=(dim ** -0.5) * jax.random.normal(ks[5], (dim,), F32),
        fc1_w=(dim ** -0.5) * jax.random.normal(ks[6], (hidden, dim), F32),
        fc1_b=(dim ** -0.5) * jax.random.normal(ks[7], (hidden,), F32),
    )


# ---------------------------------------------------------------------------
# pure-JAX f32 reference (FFT path, same reference quirks) for the self-check
# ---------------------------------------------------------------------------
def _reference_forward(x, params, *, h, w):
    B, N, C = x.shape

    def ln(v, g, b):
        mu = jnp.mean(v, -1, keepdims=True)
        var = jnp.mean((v - mu) ** 2, -1, keepdims=True)
        return (v - mu) * jax.lax.rsqrt(var + LN_EPS) * g + b

    y = ln(x, params["ln1_g"], params["ln1_b"])
    bias = jnp.einsum('bnc,oc->bno', y, params["conv_w"]) + params["conv_b"]
    nb = params["w1"].shape[1]
    bs = C // nb
    X = jnp.fft.rfft2(y.reshape(B, h, w, C), axes=(1, 2), norm="ortho")
    wf = X.shape[2]
    Xb = X.reshape(B, h, wf, nb, bs)
    mult = lambda t, wgt: jnp.einsum('...bd,bdk->...bk', t, wgt)
    o1r = jax.nn.relu(mult(Xb.real, params["w1"][0]) - mult(Xb.imag, params["w1"][1])
                      + params["b1"][0])
    o1i = jax.nn.relu(mult(Xb.real, params["w1"][1]) + mult(Xb.imag, params["w1"][0])
                      + params["b1"][1])
    o2r = mult(o1r, params["w2"][0]) - mult(o1i, params["w2"][1]) + params["b2"][0]
    # reference quirk: uses the updated real part
    o2i = mult(o2r, params["w2"][1]) + mult(o1i, params["w2"][0]) + params["b2"][1]
    Xc = (o2r + 1j * o2i).reshape(B, h, wf, C)
    spat = jnp.fft.irfft2(Xc, s=(h, w), axes=(1, 2), norm="ortho").reshape(B, N, C)
    x1 = x + spat + bias
    z = ln(x1, params["ln2_g"], params["ln2_b"])
    hid = jnp.einsum('bnc,hc->bnh', z, params["fc1_w"]) + params["fc1_b"]
    hid = 0.5 * hid * (1.0 + jax.lax.erf(hid / jnp.sqrt(2.0)))
    k = params["fc1_w"].shape[0] // C
    pooled = jnp.mean(hid.reshape(B, N, C, k), axis=-1)
    return x1 + pooled


if __name__ == "__main__":
    # Small but lane-dense demo consistent with GF_Block geometry:
    # h = w = img_size/patch_size = 8 -> N = 64 tokens; dim = 128 keeps the channel
    # axis filling the 128-lane vreg; mlp_ratio = 2 -> hidden = 256.
    B, C, h, w = 2, 128, 8, 8
    N = h * w
    key = jax.random.PRNGKey(0)
    k_x, k_p = jax.random.split(key)
    params = init_params(k_p, C, mlp_ratio=2.0)

    bb = _pick_batch_tile(B)                       # demo: bb=1 -> grid=(2,)
    prep = prepare_params(params, h=h, w=w, batch_tile=bb)   # numpy prep, outside jit
    x = jax.random.normal(k_x, (B, N, C), F32)

    fwd = jax.jit(lambda xx: fourier_net_block(xx, prep))
    out = fwd(x)
    jax.block_until_ready(out)
    assert out.shape == (B, N, C) and out.dtype == F32
    assert bool(jnp.all(jnp.isfinite(out)))

    # loose tolerance: bf16 matmul operands with f32 accumulation vs. f32 reference
    ref = _reference_forward(x, params, h=h, w=w)
    err = float(jnp.max(jnp.abs(out - ref)))
    assert err < 2e-1, f"max abs error {err} vs f32 reference"
    print("KERNEL_OK")
</pallas_src>

<mosaic_0001>
module attributes {stable_mosaic.version = 11 : i64} {
  func.func @_fourier_block_kernel(%arg0: i32, %arg1: memref<64x128xf32, #tpu.memory_space<vmem>>, %arg2: memref<40x64xf32, #tpu.memory_space<vmem>>, %arg3: memref<40x64xf32, #tpu.memory_space<vmem>>, %arg4: memref<64x80xf32, #tpu.memory_space<vmem>>, %arg5: memref<1x128xf32, #tpu.memory_space<vmem>>, %arg6: memref<1x128xf32, #tpu.memory_space<vmem>>, %arg7: memref<128x128xbf16, #tpu.memory_space<vmem>>, %arg8: memref<1x128xf32, #tpu.memory_space<vmem>>, %arg9: memref<256x256xbf16, #tpu.memory_space<vmem>>, %arg10: memref<1x256xf32, #tpu.memory_space<vmem>>, %arg11: memref<256x128xbf16, #tpu.memory_space<vmem>>, %arg12: memref<256x128xbf16, #tpu.memory_space<vmem>>, %arg13: memref<1x128xf32, #tpu.memory_space<vmem>>, %arg14: memref<1x128xf32, #tpu.memory_space<vmem>>, %arg15: memref<1x128xf32, #tpu.memory_space<vmem>>, %arg16: memref<1x128xf32, #tpu.memory_space<vmem>>, %arg17: memref<128x256xbf16, #tpu.memory_space<vmem>>, %arg18: memref<1x256xf32, #tpu.memory_space<vmem>>, %arg19: memref<256x128xbf16, #tpu.memory_space<vmem>>, %arg20: memref<64x128xf32, #tpu.memory_space<vmem>>) attributes {dimension_semantics = [#tpu.dimension_semantics<parallel>], iteration_bounds = array<i64: 2>, scalar_prefetch = 0 : i64, scratch_operands = 0 : i64, tpu.core_type = #tpu.core_type<tc>, window_params = [{transform_indices = @transform_0, window_bounds = array<i64: 64, 128>}, {pipeline_mode = #tpu.pipeline_mode<synchronous>, transform_indices = @transform_1, window_bounds = array<i64: 40, 64>}, {pipeline_mode = #tpu.pipeline_mode<synchronous>, transform_indices = @transform_2, window_bounds = array<i64: 40, 64>}, {pipeline_mode = #tpu.pipeline_mode<synchronous>, transform_indices = @transform_3, window_bounds = array<i64: 64, 80>}, {pipeline_mode = #tpu.pipeline_mode<synchronous>, transform_indices = @transform_4, window_bounds = array<i64: 1, 128>}, {pipeline_mode = #tpu.pipeline_mode<synchronous>, transform_indices = @transform_5, window_bounds = array<i64: 1, 128>}, {pipeline_mode = #tpu.pipeline_mode<synchronous>, transform_indices = @transform_6, window_bounds = array<i64: 128, 128>}, {pipeline_mode = #tpu.pipeline_mode<synchronous>, transform_indices = @transform_7, window_bounds = array<i64: 1, 128>}, {pipeline_mode = #tpu.pipeline_mode<synchronous>, transform_indices = @transform_8, window_bounds = array<i64: 256, 256>}, {pipeline_mode = #tpu.pipeline_mode<synchronous>, transform_indices = @transform_9, window_bounds = array<i64: 1, 256>}, {pipeline_mode = #tpu.pipeline_mode<synchronous>, transform_indices = @transform_10, window_bounds = array<i64: 256, 128>}, {pipeline_mode = #tpu.pipeline_mode<synchronous>, transform_indices = @transform_11, window_bounds = array<i64: 256, 128>}, {pipeline_mode = #tpu.pipeline_mode<synchronous>, transform_indices = @transform_12, window_bounds = array<i64: 1, 128>}, {pipeline_mode = #tpu.pipeline_mode<synchronous>, transform_indices = @transform_13, window_bounds = array<i64: 1, 128>}, {pipeline_mode = #tpu.pipeline_mode<synchronous>, transform_indices = @transform_14, window_bounds = array<i64: 1, 128>}, {pipeline_mode = #tpu.pipeline_mode<synchronous>, transform_indices = @transform_15, window_bounds = array<i64: 1, 128>}, {pipeline_mode = #tpu.pipeline_mode<synchronous>, transform_indices = @transform_16, window_bounds = array<i64: 128, 256>}, {pipeline_mode = #tpu.pipeline_mode<synchronous>, transform_indices = @transform_17, window_bounds = array<i64: 1, 256>}, {pipeline_mode = #tpu.pipeline_mode<synchronous>, transform_indices = @transform_18, window_bounds = array<i64: 256, 128>}, {transform_indices = @transform_19, window_bounds = array<i64: 64, 128>}]} {
    %c0 = arith.constant 0 : index
    %c0_0 = arith.constant 0 : index
    %0 = vector.load %arg1[%c0, %c0_0] : memref<64x128xf32, #tpu.memory_space<vmem>>, vector<64x128xf32>
    %cst = arith.constant dense<0.000000e+00> : vector<64xf32>
    %1 = vector.multi_reduction <add>, %0, %cst [1] : vector<64x128xf32> to vector<64xf32>
    %2 = vector.shape_cast %1 : vector<64xf32> to vector<64x1xf32>
    %cst_1 = arith.constant 1.280000e+02 : f32
    %3 = vector.broadcast %cst_1 : f32 to vector<64x1xf32>
    %4 = arith.divf %2, %3 : vector<64x1xf32>
    %5 = vector.broadcast %4 : vector<64x1xf32> to vector<64x128xf32>
    %6 = arith.subf %0, %5 : vector<64x128xf32>
    %7 = arith.mulf %6, %6 : vector<64x128xf32>
    %cst_2 = arith.constant dense<0.000000e+00> : vector<64xf32>
    %8 = vector.multi_reduction <add>, %7, %cst_2 [1] : vector<64x128xf32> to vector<64xf32>
    %9 = vector.shape_cast %8 : vector<64xf32> to vector<64x1xf32>
    %cst_3 = arith.constant 1.280000e+02 : f32
    %10 = vector.broadcast %cst_3 : f32 to vector<64x1xf32>
    %11 = arith.divf %9, %10 : vector<64x1xf32>
    %12 = vector.broadcast %4 : vector<64x1xf32> to vector<64x128xf32>
    %13 = arith.subf %0, %12 : vector<64x128xf32>
    %cst_4 = arith.constant 9.99999997E-7 : f32
    %14 = vector.broadcast %cst_4 : f32 to vector<64x1xf32>
    %15 = arith.addf %11, %14 : vector<64x1xf32>
    %16 = math.rsqrt %15 : vector<64x1xf32>
    %17 = vector.broadcast %16 : vector<64x1xf32> to vector<64x128xf32>
    %18 = arith.mulf %13, %17 : vector<64x128xf32>
    %c0_5 = arith.constant 0 : index
    %c0_6 = arith.constant 0 : index
    %19 = vector.load %arg5[%c0_5, %c0_6] : memref<1x128xf32, #tpu.memory_space<vmem>>, vector<1x128xf32>
    %20 = vector.broadcast %19 : vector<1x128xf32> to vector<64x128xf32>
    %21 = arith.mulf %18, %20 : vector<64x128xf32>
    %c0_7 = arith.constant 0 : index
    %c0_8 = arith.constant 0 : index
    %22 = vector.load %arg6[%c0_7, %c0_8] : memref<1x128xf32, #tpu.memory_space<vmem>>, vector<1x128xf32>
    %23 = vector.broadcast %22 : vector<1x128xf32> to vector<64x128xf32>
    %24 = arith.addf %21, %23 : vector<64x128xf32>
    %25 = arith.truncf %24 : vector<64x128xf32> to vector<64x128xbf16>
    %c0_9 = arith.constant 0 : index
    %c0_10 = arith.constant 0 : index
    %26 = vector.load %arg7[%c0_9, %c0_10] : memref<128x128xbf16, #tpu.memory_space<vmem>>, vector<128x128xbf16>
    %cst_11 = arith.constant dense<0.000000e+00> : vector<64x128xf32>
    %27 = tpu.matmul %25, %26, %cst_11 {dimension_numbers = #tpu.dot_dimension_numbers<[1], [0], [0], [1], [0, 0, 1, 1], [], []>} : vector<64x128xbf16>, vector<128x128xbf16>, vector<64x128xf32> -> vector<64x128xf32>
    %c0_12 = arith.constant 0 : index
    %c0_13 = arith.constant 0 : index
    %28 = vector.load %arg8[%c0_12, %c0_13] : memref<1x128xf32, #tpu.memory_space<vmem>>, vector<1x128xf32>
    %29 = vector.broadcast %28 : vector<1x128xf32> to vector<64x128xf32>
    %30 = arith.addf %27, %29 : vector<64x128xf32>
    %c0_14 = arith.constant 0 : index
    %c0_15 = arith.constant 0 : index
    %31 = vector.load %arg2[%c0_14, %c0_15] : memref<40x64xf32, #tpu.memory_space<vmem>>, vector<40x64xf32>
    %cst_16 = arith.constant dense<0.000000e+00> : vector<40x128xf32>
    %32 = tpu.matmul %31, %24, %cst_16 {dimension_numbers = #tpu.dot_dimension_numbers<[1], [0], [0], [1], [0, 0, 1, 1], [], []>} : vector<40x64xf32>, vector<64x128xf32>, vector<40x128xf32> -> vector<40x128xf32>
    %c0_17 = arith.constant 0 : index
    %c0_18 = arith.constant 0 : index
    %33 = vector.load %arg3[%c0_17, %c0_18] : memref<40x64xf32, #tpu.memory_space<vmem>>, vector<40x64xf32>
    %cst_19 = arith.constant dense<0.000000e+00> : vector<40x128xf32>
    %34 = tpu.matmul %33, %24, %cst_19 {dimension_numbers = #tpu.dot_dimension_numbers<[1], [0], [0], [1], [0, 0, 1, 1], [], []>} : vector<40x64xf32>, vector<64x128xf32>, vector<40x128xf32> -> vector<40x128xf32>
    %35 = tpu.concatenate %32, %34 in 1 : vector<40x128xf32>, vector<40x128xf32> -> vector<40x256xf32>
    %36 = arith.truncf %35 : vector<40x256xf32> to vector<40x256xbf16>
    %c0_20 = arith.constant 0 : index
    %c0_21 = arith.constant 0 : index
    %37 = vector.load %arg9[%c0_20, %c0_21] : memref<256x256xbf16, #tpu.memory_space<vmem>>, vector<256x256xbf16>
    %cst_22 = arith.constant dense<0.000000e+00> : vector<40x256xf32>
    %38 = tpu.matmul %36, %37, %cst_22 {dimension_numbers = #tpu.dot_dimension_numbers<[1], [0], [0], [1], [0, 0, 1, 1], [], []>} : vector<40x256xbf16>, vector<256x256xbf16>, vector<40x256xf32> -> vector<40x256xf32>
    %c0_23 = arith.constant 0 : index
    %c0_24 = arith.constant 0 : index
    %39 = vector.load %arg10[%c0_23, %c0_24] : memref<1x256xf32, #tpu.memory_space<vmem>>, vector<1x256xf32>
    %40 = vector.broadcast %39 : vector<1x256xf32> to vector<40x256xf32>
    %41 = arith.addf %38, %40 : vector<40x256xf32>
    %cst_25 = arith.constant 0.000000e+00 : f32
    %42 = vector.broadcast %cst_25 : f32 to vector<40x256xf32>
    %43 = arith.maximumf %41, %42 : vector<40x256xf32>
    %44 = arith.truncf %43 : vector<40x256xf32> to vector<40x256xbf16>
    %c0_26 = arith.constant 0 : index
    %c0_27 = arith.constant 0 : index
    %45 = vector.load %arg11[%c0_26, %c0_27] : memref<256x128xbf16, #tpu.memory_space<vmem>>, vector<256x128xbf16>
    %cst_28 = arith.constant dense<0.000000e+00> : vector<40x128xf32>
    %46 = tpu.matmul %44, %45, %cst_28 {dimension_numbers = #tpu.dot_dimension_numbers<[1], [0], [0], [1], [0, 0, 1, 1], [], []>} : vector<40x256xbf16>, vector<256x128xbf16>, vector<40x128xf32> -> vector<40x128xf32>
    %c0_29 = arith.constant 0 : index
    %c0_30 = arith.constant 0 : index
    %47 = vector.load %arg13[%c0_29, %c0_30] : memref<1x128xf32, #tpu.memory_space<vmem>>, vector<1x128xf32>
    %48 = vector.broadcast %47 : vector<1x128xf32> to vector<40x128xf32>
    %49 = arith.addf %46, %48 : vector<40x128xf32>
    %50 = arith.truncf %49 : vector<40x128xf32> to vector<40x128xbf16>
    %51 = vector.extract_strided_slice %44 {offsets = [0, 128], sizes = [40, 128], strides = [1, 1]} : vector<40x256xbf16> to vector<40x128xbf16>
    %52 = tpu.concatenate %50, %51 in 1 : vector<40x128xbf16>, vector<40x128xbf16> -> vector<40x256xbf16>
    %c0_31 = arith.constant 0 : index
    %c0_32 = arith.constant 0 : index
    %53 = vector.load %arg12[%c0_31, %c0_32] : memref<256x128xbf16, #tpu.memory_space<vmem>>, vector<256x128xbf16>
    %cst_33 = arith.constant dense<0.000000e+00> : vector<40x128xf32>
    %54 = tpu.matmul %52, %53, %cst_33 {dimension_numbers = #tpu.dot_dimension_numbers<[1], [0], [0], [1], [0, 0, 1, 1], [], []>} : vector<40x256xbf16>, vector<256x128xbf16>, vector<40x128xf32> -> vector<40x128xf32>
    %c0_34 = arith.constant 0 : index
    %c0_35 = arith.constant 0 : index
    %55 = vector.load %arg14[%c0_34, %c0_35] : memref<1x128xf32, #tpu.memory_space<vmem>>, vector<1x128xf32>
    %56 = vector.broadcast %55 : vector<1x128xf32> to vector<40x128xf32>
    %57 = arith.addf %54, %56 : vector<40x128xf32>
    %58 = tpu.concatenate %49, %57 in 0 : vector<40x128xf32>, vector<40x128xf32> -> vector<80x128xf32>
    %c0_36 = arith.constant 0 : index
    %c0_37 = arith.constant 0 : index
    %59 = vector.load %arg4[%c0_36, %c0_37] : memref<64x80xf32, #tpu.memory_space<vmem>>, vector<64x80xf32>
    %cst_38 = arith.constant dense<0.000000e+00> : vector<64x128xf32>
    %60 = tpu.matmul %59, %58, %cst_38 {dimension_numbers = #tpu.dot_dimension_numbers<[1], [0], [0], [1], [0, 0, 1, 1], [], []>} : vector<64x80xf32>, vector<80x128xf32>, vector<64x128xf32> -> vector<64x128xf32>
    %61 = arith.addf %0, %60 : vector<64x128xf32>
    %62 = arith.addf %61, %30 : vector<64x128xf32>
    %cst_39 = arith.constant dense<0.000000e+00> : vector<64xf32>
    %63 = vector.multi_reduction <add>, %62, %cst_39 [1] : vector<64x128xf32> to vector<64xf32>
    %64 = vector.shape_cast %63 : vector<64xf32> to vector<64x1xf32>
    %cst_40 = arith.constant 1.280000e+02 : f32
    %65 = vector.broadcast %cst_40 : f32 to vector<64x1xf32>
    %66 = arith.divf %64, %65 : vector<64x1xf32>
    %67 = vector.broadcast %66 : vector<64x1xf32> to vector<64x128xf32>
    %68 = arith.subf %62, %67 : vector<64x128xf32>
    %69 = arith.mulf %68, %68 : vector<64x128xf32>
    %cst_41 = arith.constant dense<0.000000e+00> : vector<64xf32>
    %70 = vector.multi_reduction <add>, %69, %cst_41 [1] : vector<64x128xf32> to vector<64xf32>
    %71 = vector.shape_cast %70 : vector<64xf32> to vector<64x1xf32>
    %cst_42 = arith.constant 1.280000e+02 : f32
    %72 = vector.broadcast %cst_42 : f32 to vector<64x1xf32>
    %73 = arith.divf %71, %72 : vector<64x1xf32>
    %74 = vector.broadcast %66 : vector<64x1xf32> to vector<64x128xf32>
    %75 = arith.subf %62, %74 : vector<64x128xf32>
    %cst_43 = arith.constant 9.99999997E-7 : f32
    %76 = vector.broadcast %cst_43 : f32 to vector<64x1xf32>
    %77 = arith.addf %73, %76 : vector<64x1xf32>
    %78 = math.rsqrt %77 : vector<64x1xf32>
    %79 = vector.broadcast %78 : vector<64x1xf32> to vector<64x128xf32>
    %80 = arith.mulf %75, %79 : vector<64x128xf32>
    %c0_44 = arith.constant 0 : index
    %c0_45 = arith.constant 0 : index
    %81 = vector.load %arg15[%c0_44, %c0_45] : memref<1x128xf32, #tpu.memory_space<vmem>>, vector<1x128xf32>
    %82 = vector.broadcast %81 : vector<1x128xf32> to vector<64x128xf32>
    %83 = arith.mulf %80, %82 : vector<64x128xf32>
    %c0_46 = arith.constant 0 : index
    %c0_47 = arith.constant 0 : index
    %84 = vector.load %arg16[%c0_46, %c0_47] : memref<1x128xf32, #tpu.memory_space<vmem>>, vector<1x128xf32>
    %85 = vector.broadcast %84 : vector<1x128xf32> to vector<64x128xf32>
    %86 = arith.addf %83, %85 : vector<64x128xf32>
    %87 = arith.truncf %86 : vector<64x128xf32> to vector<64x128xbf16>
    %c0_48 = arith.constant 0 : index
    %c0_49 = arith.constant 0 : index
    %88 = vector.load %arg17[%c0_48, %c0_49] : memref<128x256xbf16, #tpu.memory_space<vmem>>, vector<128x256xbf16>
    %cst_50 = arith.constant dense<0.000000e+00> : vector<64x256xf32>
    %89 = tpu.matmul %87, %88, %cst_50 {dimension_numbers = #tpu.dot_dimension_numbers<[1], [0], [0], [1], [0, 0, 1, 1], [], []>} : vector<64x128xbf16>, vector<128x256xbf16>, vector<64x256xf32> -> vector<64x256xf32>
    %c0_51 = arith.constant 0 : index
    %c0_52 = arith.constant 0 : index
    %90 = vector.load %arg18[%c0_51, %c0_52] : memref<1x256xf32, #tpu.memory_space<vmem>>, vector<1x256xf32>
    %91 = vector.broadcast %90 : vector<1x256xf32> to vector<64x256xf32>
    %92 = arith.addf %89, %91 : vector<64x256xf32>
    %cst_53 = arith.constant 5.000000e-01 : f32
    %93 = vector.broadcast %cst_53 : f32 to vector<64x256xf32>
    %94 = arith.mulf %93, %92 : vector<64x256xf32>
    %cst_54 = arith.constant 0.707106769 : f32
    %95 = vector.broadcast %cst_54 : f32 to vector<64x256xf32>
    %96 = arith.mulf %92, %95 : vector<64x256xf32>
    %97 = math.erf %96 : vector<64x256xf32>
    %cst_55 = arith.constant 1.000000e+00 : f32
    %98 = vector.broadcast %cst_55 : f32 to vector<64x256xf32>
    %99 = arith.addf %98, %97 : vector<64x256xf32>
    %100 = arith.mulf %94, %99 : vector<64x256xf32>
    %101 = arith.truncf %100 : vector<64x256xf32> to vector<64x256xbf16>
    %c0_56 = arith.constant 0 : index
    %c0_57 = arith.constant 0 : index
    %102 = vector.load %arg19[%c0_56, %c0_57] : memref<256x128xbf16, #tpu.memory_space<vmem>>, vector<256x128xbf16>
    %cst_58 = arith.constant dense<0.000000e+00> : vector<64x128xf32>
    %103 = tpu.matmul %101, %102, %cst_58 {dimension_numbers = #tpu.dot_dimension_numbers<[1], [0], [0], [1], [0, 0, 1, 1], [], []>} : vector<64x256xbf16>, vector<256x128xbf16>, vector<64x128xf32> -> vector<64x128xf32>
    %cst_59 = arith.constant 5.000000e-01 : f32
    %104 = vector.broadcast %cst_59 : f32 to vector<64x128xf32>
    %105 = arith.mulf %103, %104 : vector<64x128xf32>
    %106 = arith.addf %62, %105 : vector<64x128xf32>
    %c0_60 = arith.constant 0 : index
    %c0_61 = arith.constant 0 : index
    %107 = vector.load %arg20[%c0_60, %c0_61] : memref<64x128xf32, #tpu.memory_space<vmem>>, vector<64x128xf32>
    tpu.vector_store %arg20[%c0_60, %c0_61], %106 {strides = array<i32>} : memref<64x128xf32, #tpu.memory_space<vmem>>, vector<64x128xf32>,
    return
  }
  func.func @transform_0(%arg0: i32) -> (i32, i32) {
    %c0_i32 = arith.constant 0 : i32
    %c0_i32_0 = arith.constant 0 : i32
    return %arg0, %c0_i32 : i32, i32
  }
  func.func @transform_1(%arg0: i32) -> (i32, i32) {
    %c0_i32 = arith.constant 0 : i32
    %c0_i32_0 = arith.constant 0 : i32
    %c0_i32_1 = arith.constant 0 : i32
    return %c0_i32, %c0_i32_0 : i32, i32
  }
  func.func @transform_2(%arg0: i32) -> (i32, i32) {
    %c0_i32 = arith.constant 0 : i32
    %c0_i32_0 = arith.constant 0 : i32
    %c0_i32_1 = arith.constant 0 : i32
    return %c0_i32, %c0_i32_0 : i32, i32
  }
  func.func @transform_3(%arg0: i32) -> (i32, i32) {
    %c0_i32 = arith.constant 0 : i32
    %c0_i32_0 = arith.constant 0 : i32
    %c0_i32_1 = arith.constant 0 : i32
    return %c0_i32, %c0_i32_0 : i32, i32
  }
  func.func @transform_4(%arg0: i32) -> (i32, i32) {
    %c0_i32 = arith.constant 0 : i32
    %c0_i32_0 = arith.constant 0 : i32
    %c0_i32_1 = arith.constant 0 : i32
    return %c0_i32, %c0_i32_0 : i32, i32
  }
  func.func @transform_5(%arg0: i32) -> (i32, i32) {
    %c0_i32 = arith.constant 0 : i32
    %c0_i32_0 = arith.constant 0 : i32
    %c0_i32_1 = arith.constant 0 : i32
    return %c0_i32, %c0_i32_0 : i32, i32
  }
  func.func @transform_6(%arg0: i32) -> (i32, i32) {
    %c0_i32 = arith.constant 0 : i32
    %c0_i32_0 = arith.constant 0 : i32
    %c0_i32_1 = arith.constant 0 : i32
    return %c0_i32, %c0_i32_0 : i32, i32
  }
  func.func @transform_7(%arg0: i32) -> (i32, i32) {
    %c0_i32 = arith.constant 0 : i32
    %c0_i32_0 = arith.constant 0 : i32
    %c0_i32_1 = arith.constant 0 : i32
    return %c0_i32, %c0_i32_0 : i32, i32
  }
  func.func @transform_8(%arg0: i32) -> (i32, i32) {
    %c0_i32 = arith.constant 0 : i32
    %c0_i32_0 = arith.constant 0 : i32
    %c0_i32_1 = arith.constant 0 : i32
    return %c0_i32, %c0_i32_0 : i32, i32
  }
  func.func @transform_9(%arg0: i32) -> (i32, i32) {
    %c0_i32 = arith.constant 0 : i32
    %c0_i32_0 = arith.constant 0 : i32
    %c0_i32_1 = arith.constant 0 : i32
    return %c0_i32, %c0_i32_0 : i32, i32
  }
  func.func @transform_10(%arg0: i32) -> (i32, i32) {
    %c0_i32 = arith.constant 0 : i32
    %c0_i32_0 = arith.constant 0 : i32
    %c0_i32_1 = arith.constant 0 : i32
    return %c0_i32, %c0_i32_0 : i32, i32
  }
  func.func @transform_11(%arg0: i32) -> (i32, i32) {
    %c0_i32 = arith.constant 0 : i32
    %c0_i32_0 = arith.constant 0 : i32
    %c0_i32_1 = arith.constant 0 : i32
    return %c0_i32, %c0_i32_0 : i32, i32
  }
  func.func @transform_12(%arg0: i32) -> (i32, i32) {
    %c0_i32 = arith.constant 0 : i32
    %c0_i32_0 = arith.constant 0 : i32
    %c0_i32_1 = arith.constant 0 : i32
    return %c0_i32, %c0_i32_0 : i32, i32
  }
  func.func @transform_13(%arg0: i32) -> (i32, i32) {
    %c0_i32 = arith.constant 0 : i32
    %c0_i32_0 = arith.constant 0 : i32
    %c0_i32_1 = arith.constant 0 : i32
    return %c0_i32, %c0_i32_0 : i32, i32
  }
  func.func @transform_14(%arg0: i32) -> (i32, i32) {
    %c0_i32 = arith.constant 0 : i32
    %c0_i32_0 = arith.constant 0 : i32
    %c0_i32_1 = arith.constant 0 : i32
    return %c0_i32, %c0_i32_0 : i32, i32
  }
  func.func @transform_15(%arg0: i32) -> (i32, i32) {
    %c0_i32 = arith.constant 0 : i32
    %c0_i32_0 = arith.constant 0 : i32
    %c0_i32_1 = arith.constant 0 : i32
    return %c0_i32, %c0_i32_0 : i32, i32
  }
  func.func @transform_16(%arg0: i32) -> (i32, i32) {
    %c0_i32 = arith.constant 0 : i32
    %c0_i32_0 = arith.constant 0 : i32
    %c0_i32_1 = arith.constant 0 : i32
    return %c0_i32, %c0_i32_0 : i32, i32
  }
  func.func @transform_17(%arg0: i32) -> (i32, i32) {
    %c0_i32 = arith.constant 0 : i32
    %c0_i32_0 = arith.constant 0 : i32
    %c0_i32_1 = arith.constant 0 : i32
    return %c0_i32, %c0_i32_0 : i32, i32
  }
  func.func @transform_18(%arg0: i32) -> (i32, i32) {
    %c0_i32 = arith.constant 0 : i32
    %c0_i32_0 = arith.constant 0 : i32
    %c0_i32_1 = arith.constant 0 : i32
    return %c0_i32, %c0_i32_0 : i32, i32
  }
  func.func @transform_19(%arg0: i32) -> (i32, i32) {
    %c0_i32 = arith.constant 0 : i32
    %c0_i32_0 = arith.constant 0 : i32
    return %arg0, %c0_i32 : i32, i32
  }
}

</mosaic_0001>

<bundles_post_ra>
// kernel: _lambda_.1
= control target key start
LH: loop header
LB: loop body
LE: loop exit
PB: predicated region body
PF: predicated region fallthrough
CT: control target
= control target key end

     0   :  { %s4760_s0 = inlined_call_operand.hbm [shape: f32[128,128], index: 0, kind: input, shape index: {}]   ;;  %s4761_s1 = inlined_call_operand.hbm [shape: f32[40,64], index: 1, kind: input, shape index: {}]   ;;  %s4762_s2 = inlined_call_operand.hbm [shape: f32[40,64], index: 2, kind: input, shape index: {}]   ;;  %s4763_s3 = inlined_call_operand.hbm [shape: f32[64,80], index: 3, kind: input, shape index: {}]   ;;  %s4764_s4 = inlined_call_operand.vmem [shape: f32[1,128], index: 4, kind: input, shape index: {}, may-alias: {4,14}]   ;;  %s4765_s5 = inlined_call_operand.vmem [shape: f32[1,128], index: 5, kind: input, shape index: {}, may-alias: {5,15}]   ;;  %s4766_s6 = inlined_call_operand.hbm [shape: bf16[128,128], index: 6, kind: input, shape index: {}]   ;;  %s4767_s7 = inlined_call_operand.vmem [shape: f32[1,128], index: 7, kind: input, shape index: {}]   ;;  %s4768_s8 = inlined_call_operand.hbm [shape: bf16[256,256], index: 8, kind: input, shape index: {}]   ;;  %s4769_s9 = inlined_call_operand.vmem [shape: f32[1,256], index: 9, kind: input, shape index: {}]   ;;  %s4770_s10 = inlined_call_operand.hbm [shape: bf16[256,128], index: 10, kind: input, shape index: {}]   ;;  %s4771_s11 = inlined_call_operand.hbm [shape: bf16[256,128], index: 11, kind: input, shape index: {}]   ;;  %s4772_s12 = inlined_call_operand.vmem [shape: f32[1,128], index: 12, kind: input, shape index: {}]   ;;  %s4773_s13 = inlined_call_operand.vmem [shape: f32[1,128], index: 13, kind: input, shape index: {}]   ;;  %s4774_s14 = inlined_call_operand.vmem [shape: f32[1,128], index: 14, kind: input, shape index: {}, may-alias: {4,14}]   ;;  %s4775_s15 = inlined_call_operand.vmem [shape: f32[1,128], index: 15, kind: input, shape index: {}, may-alias: {5,15}]   ;;  %s4776_s16 = inlined_call_operand.hbm [shape: bf16[128,256], index: 16, kind: input, shape index: {}]   ;;  %s4777_s17 = inlined_call_operand.vmem [shape: f32[1,256], index: 17, kind: input, shape index: {}]   ;;  %s4778_s18 = inlined_call_operand.hbm [shape: bf16[256,128], index: 18, kind: input, shape index: {}]   ;;  %s4779_s19 = inlined_call_operand.hbm [shape: f32[128,128], index: 19, kind: output, shape index: {}]  }
   0x1   :  { %4793 = sst [smem:[#allocation28_spill]] %s4760_s0 }
   0x2   :  { %4794 = sst [smem:[#allocation29_spill]] %s4761_s1 }
   0x3   :  { %4795 = sst [smem:[#allocation30_spill]] %s4762_s2 }
   0x4   :  { %4796 = sst [smem:[#allocation31_spill]] %s4763_s3 }
   0x5   :  { %4797 = sst [smem:[#allocation32_spill]] %s4766_s6 }
   0x6   :  { %4798 = sst [smem:[#allocation33_spill]] %s4768_s8 }
   0x7   :  { %4799 = sst [smem:[#allocation34_spill]] %s4770_s10 }
   0x8   :  { %4800 = sst [smem:[#allocation35_spill]] %s4771_s11 }
   0x9   :  { %4801 = sst [smem:[#allocation36_spill]] %s4774_s14 }
   0xa   :  { %4802 = sst [smem:[#allocation37_spill]] %s4775_s15 }
   0xb   :  { %4803 = sst [smem:[#allocation38_spill]] %s4776_s16 }
   0xc   :  { %4804 = sst [smem:[#allocation39_spill]] %s4777_s17 }
   0xd   :  { %4805 = sst [smem:[#allocation40_spill]] %s4778_s18 }
   0xe   :  { %4806 = sst [smem:[#allocation41_spill]] %s4779_s19 }
   0xf   :  { %24 = vsyncpa [#allocation3], 0 }
  0x10   :  { %26 = vsyncpa [#allocation3 + $0x1], 0 }
  0x11   :  { %27 = vsyncpa [#allocation6], 0 }
  0x12   :  { %28 = vsyncpa [#allocation9], 0 }
  0x13   :  { %29 = vsyncpa [#allocation12], 0 }
  0x14   :  { %30 = vsyncpa [#allocation15], 0 }
  0x15   :  { %31 = vsyncpa [#allocation18], 0 }
  0x16   :  { %32 = vsyncpa [#allocation4], 0 }
  0x17   :  { %34 = vsyncpa [#allocation4 + $0x1], 0  ;;  %s4125_s0 = smov 0   ;;  %s4127_s30 = smov 0  }
  0x18   :  { %s4129_s20 = smov 0   ;;  %s4131_s21 = smov 0  }
  0x19 LB: > { %s4005_s1 = smov [#allocation5]   ;;  %s4146_s2 = sadd.s32 4294967295, %s4003_s21   ;;  %s4003_s21 = sphi %s4131_s21, %s4852_s21   ;;  %s3999_s20 = sphi %s4129_s20, %s4851_s20   ;;  %s3995_s30 = sphi %s4127_s30, %s4850_s30   ;;  %s3991_s0 = sphi %s4125_s0, %s4849_s0  }
  0x1a   : > { %s487_s22 = sshll.u32 %s4005_s1, 4  ;;  %p2851_p0 = scmp.ge.s32.totalorder %s4003_s21, 1  ;;  %s488_s22 = int_to_ptr.vmem [resolvable:$true] %s487_s22 }
  0x1b   : > { %p4789_p1 = scmp.eq.s32.totalorder %s4146_s2, 0  ;;  %p475_p2 = scmp.lt.s32.totalorder %s4003_s21, 3 }
  0x1c   : > { %s4006_s24 = smov [#allocation8]   ;;  %s4007_s26 = smov [#allocation11]  }
  0x1d   : > { %p4151_p3 = pnand %p2851_p0, %p475_p2  ;;  %s513_s25 = sshll.u32 %s4006_s24, 4  ;;  %s4164_s25 = int_to_ptr.vmem [resolvable:$true] %s513_s25 }
  0x1e   : > { %s548_s27 = sshll.u32 %s4007_s26, 4  ;;  %s3668_s29 = scalar_lea.vmem %s488_s22, 640  ;;  %s4166_s27 = int_to_ptr.vmem [resolvable:$true] %s548_s27 }
  0x1f   : > { %s4807_s23 = scalar_select %p4151_p3, 1, 0 }
  0x20   : > { %p3351_p5 = pneg %p4151_p3  ;;  %p3669_p8 = scmp.ne.s32.totalorder %s488_s22, %s3668_s29 }
  0x21   : > { %p3676_p11 = scmp.lt.s32.totalorder %s488_s22, %s488_s22  ;;  %p3677_p12 = scmp.lt.s32.totalorder %s3668_s29, %s3668_s29 }
  0x22   : > { %p4160_p6 = pnand %p3351_p5, %p4789_p1 }
  0x23   : > { %p3678_p13 = por %p3677_p12, %p3676_p11 }
  0x24   : > { %p4170_p7 = pneg %p4160_p6 }
  0x26   : > { %p3671_p9 = pnand %p3669_p8, %p4170_p7 }
  0x28   : > { %p3672_p10 = pneg %p3671_p9 }
  0x2a   : > { %p3679_p0 = pnand %p3678_p13, %p3672_p10 }
  0x2c   : > { %3682 = shalt.err (!%p3679_p0)
}
  0x2d   : > { %s4786_s1 = smov 128   ;;  %s4788_s24 = smov 8  }
  0x2e   : > { %s4810_s17 = sld [smem:[#allocation29_spill]]  ;;  %s3694_s15 = scalar_lea.vmem %s4164_s25, 1024 }
  0x2f   : > { %p3695_p2 = scmp.ne.s32.totalorder %s4164_s25, %s3694_s15  ;;  %p3702_p9 = scmp.lt.s32.totalorder %s4164_s25, %s4164_s25 }
  0x30   : > { %p3703_p10 = scmp.lt.s32.totalorder %s3694_s15, %s3694_s15 }
  0x31   : > { %p3697_p5 = pnand %p3695_p2, %p4170_p7 }
  0x32   : > { %p3704_p11 = por %p3703_p10, %p3702_p9 }
  0x33   : > { %p3698_p8 = pneg %p3697_p5 }
  0x34   : > { %3354 = dma.hbm_to_vmem [thread:$0]  (!%p4160_p6), %s4810_s17, 640, %s488_s22, [#allocation6], %s4786_s1, %s4786_s1, %s4788_s24  }
  0x35   : > { %p3705_p12 = pnand %p3704_p11, %p3698_p8 }
  0x37   : > { %3708 = shalt.err (!%p3705_p12)
}
  0x38   : > { %s4811_s17 = sld [smem:[#allocation31_spill]]  ;;  %s3720_s22 = scalar_lea.vmem %s4166_s27, 4096 }
  0x39   : > { %p3721_p13 = scmp.ne.s32.totalorder %s4166_s27, %s3720_s22  ;;  %p3728_p5 = scmp.lt.s32.totalorder %s4166_s27, %s4166_s27 }
  0x3a   : > { %p3729_p8 = scmp.lt.s32.totalorder %s3720_s22, %s3720_s22 }
  0x3b   : > { %p3723_p0 = pnand %p3721_p13, %p4170_p7 }
  0x3c   : > { %p3730_p9 = por %p3729_p8, %p3728_p5 }
  0x3d   : > { %p3724_p2 = pneg %p3723_p0 }
  0x3e   : > { %3360 = dma.hbm_to_vmem [thread:$0]  (!%p4160_p6), %s4811_s17, 1024, %s4164_s25, [#allocation9], %s4786_s1, %s4786_s1, %s4788_s24  }
  0x3f   : > { %p3731_p10 = pnand %p3730_p9, %p3724_p2 }
  0x41   : > { %3734 = shalt.err (!%p3731_p10)
}
  0x42   : > { %s4812_s8 = sld [smem:[#allocation33_spill]]  ;;  %s4010_s25 = smov [#allocation14]  }
  0x43   : > { %s577_s29 = sshll.u32 %s4010_s25, 4  ;;  %s4011_s19 = smov [#allocation7]   ;;  %s578_s29 = int_to_ptr.vmem [resolvable:$true] %s577_s29 }
  0x44   : > { %s500_s17 = sshll.u32 %s4011_s19, 4  ;;  %s3746_s22 = scalar_lea.vmem %s578_s29, 2048  ;;  %s501_s17 = int_to_ptr.vmem [resolvable:$true] %s500_s17 }
  0x45   : > { %p3747_p11 = scmp.ne.s32.totalorder %s578_s29, %s3746_s22  ;;  %p3754_p0 = scmp.lt.s32.totalorder %s578_s29, %s578_s29 }
  0x46   : > { %p3755_p2 = scmp.lt.s32.totalorder %s3746_s22, %s3746_s22 }
  0x47   : > { %p3749_p12 = pnand %p3747_p11, %p4170_p7 }
  0x48   : > { %3366 = dma.hbm_to_vmem [thread:$0]  (!%p4160_p6), %s4812_s8, 4096, %s4166_s27, [#allocation12], %s4786_s1, %s4786_s1, %s4788_s24  }
  0x49   : > { %p3750_p13 = pneg %p3749_p12  ;;  %p3756_p5 = por %p3755_p2, %p3754_p0 }
  0x4b   : > { %p3757_p8 = pnand %p3756_p5, %p3750_p13 }
  0x4d   : > { %3760 = shalt.err (!%p3757_p8)
}
  0x4e   : > { %s4782_s14 = smov 64   ;;  %s4784_s15 = smov 4  }
  0x4f   : > { %s4813_s11 = sld [smem:[#allocation35_spill]]  ;;  %s3772_s25 = scalar_lea.vmem %s501_s17, 640 }
  0x50   : > { %p3773_p9 = scmp.ne.s32.totalorder %s501_s17, %s3772_s25  ;;  %p3780_p12 = scmp.lt.s32.totalorder %s501_s17, %s501_s17 }
  0x51   : > { %p3781_p13 = scmp.lt.s32.totalorder %s3772_s25, %s3772_s25 }
  0x52   : > { %p3775_p10 = pnand %p3773_p9, %p4170_p7 }
  0x53   : > { %p3782_p0 = por %p3781_p13, %p3780_p12 }
  0x54   : > { %p3776_p11 = pneg %p3775_p10 }
  0x55   : > { %3372 = dma.hbm_to_vmem [thread:$0]  (!%p4160_p6), %s4813_s11, 2048, %s578_s29, [#allocation15], %s4782_s14, %s4782_s14, %s4784_s15  }
  0x56   : > { %p3783_p2 = pnand %p3782_p0, %p3776_p11 }
  0x58   : > { %3786 = shalt.err (!%p3783_p2)
}
  0x59   : > { %s4814_s27 = sld [smem:[#allocation30_spill]]  ;;  %s4014_s29 = smov [#allocation10]  }
  0x5a   : > { %s532_s26 = sshll.u32 %s4014_s29, 4  ;;  %s4015_s14 = smov [#allocation13]   ;;  %s533_s26 = int_to_ptr.vmem [resolvable:$true] %s532_s26 }
  0x5b   : > { %s564_s15 = sshll.u32 %s4015_s14, 4  ;;  %s3798_s8 = scalar_lea.vmem %s533_s26, 1024  ;;  %s565_s15 = int_to_ptr.vmem [resolvable:$true] %s564_s15 }
  0x5c   : > { %p3799_p5 = scmp.ne.s32.totalorder %s533_s26, %s3798_s8  ;;  %p3806_p10 = scmp.lt.s32.totalorder %s533_s26, %s533_s26 }
  0x5d   : > { %p3807_p11 = scmp.lt.s32.totalorder %s3798_s8, %s3798_s8 }
  0x5e   : > { %p3801_p8 = pnand %p3799_p5, %p4170_p7 }
  0x5f   : > { %3357 = dma.hbm_to_vmem [thread:$0]  (!%p4160_p6), %s4814_s27, 640, %s501_s17, [#allocation6], %s4786_s1, %s4786_s1, %s4788_s24  }
  0x60   : > { %p3802_p9 = pneg %p3801_p8  ;;  %p3808_p12 = por %p3807_p11, %p3806_p10 }
  0x62   : > { %p3809_p13 = pnand %p3808_p12, %p3802_p9 }
  0x64   : > { %3812 = shalt.err (!%p3809_p13)
}
  0x65   : > { %s4815_s25 = smov 4   ;;  %s4816_s19 = smov 64  }
  0x66   : > { %s4817_s6 = sld [smem:[#allocation32_spill]]  ;;  %s3824_s14 = scalar_lea.vmem %s565_s15, 2048 }
  0x67   : > { %p3825_p0 = scmp.ne.s32.totalorder %s565_s15, %s3824_s14  ;;  %p3832_p8 = scmp.lt.s32.totalorder %s565_s15, %s565_s15 }
  0x68   : > { %p3833_p10 = scmp.lt.s32.totalorder %s3824_s14, %s3824_s14 }
  0x69   : > { %p3827_p2 = pnand %p3825_p0, %p4170_p7 }
  0x6a   : > { %p3834_p9 = por %p3833_p10, %p3832_p8 }
  0x6b   : > { %p3828_p5 = pneg %p3827_p2 }
  0x6c   : > { %3363 = dma.hbm_to_vmem [thread:$0]  (!%p4160_p6), %s4817_s6, 1024, %s533_s26, [#allocation9], %s4816_s19, %s4816_s19, %s4815_s25  }
  0x6d   : > { %p3835_p11 = pnand %p3834_p9, %p3828_p5 }
  0x6f   : > { %3838 = shalt.err (!%p3835_p11)
}
  0x70   : > { %s4818_s10 = sld [smem:[#allocation34_spill]]  ;;  %s4016_s29 = smov [#allocation16]  }
  0x71   : > { %s602_s26 = sshll.u32 %s4016_s29, 4  ;;  %s4017_s17 = smov [#allocation17]   ;;  %s603_s26 = int_to_ptr.vmem [resolvable:$true] %s602_s26 }
  0x72   : > { %s618_s22 = sshll.u32 %s4017_s17, 4  ;;  %s3850_s1 = scalar_lea.vmem %s603_s26, 2048  ;;  %s619_s22 = int_to_ptr.vmem [resolvable:$true] %s618_s22 }
  0x73   : > { %p3851_p12 = scmp.ne.s32.totalorder %s603_s26, %s3850_s1  ;;  %p3858_p2 = scmp.lt.s32.totalorder %s603_s26, %s603_s26 }
  0x74   : > { %p3859_p5 = scmp.lt.s32.totalorder %s3850_s1, %s3850_s1 }
  0x75   : > { %p3853_p13 = pnand %p3851_p12, %p4170_p7 }
  0x76   : > { %3369 = dma.hbm_to_vmem [thread:$0]  (!%p4160_p6), %s4818_s10, 2048, %s565_s15, [#allocation12], %s4816_s19, %s4816_s19, %s4815_s25  }
  0x77   : > { %p3854_p0 = pneg %p3853_p13  ;;  %p3860_p8 = por %p3859_p5, %p3858_p2 }
  0x79   : > { %p3861_p10 = pnand %p3860_p8, %p3854_p0 }
  0x7b   : > { %3864 = shalt.err (!%p3861_p10)
}
  0x7c   : > { %s4819_s14 = smov 128   ;;  %s4820_s16 = sld [smem:[#allocation38_spill]] }
  0x7d   : > { %s3876_s27 = scalar_lea.vmem %s619_s22, 2048  ;;  %p3884_p13 = scmp.lt.s32.totalorder %s619_s22, %s619_s22 }
  0x7e   : > { %p3877_p9 = scmp.ne.s32.totalorder %s619_s22, %s3876_s27  ;;  %p3885_p2 = scmp.lt.s32.totalorder %s3876_s27, %s3876_s27 }
  0x80   : > { %p3879_p11 = pnand %p3877_p9, %p4170_p7  ;;  %p3886_p0 = por %p3885_p2, %p3884_p13 }
  0x82   : > { %3375 = dma.hbm_to_vmem [thread:$0]  (!%p4160_p6), %s4820_s16, 2048, %s603_s26, [#allocation15], %s4819_s14, %s4819_s14, %s4788_s24  }
  0x83   : > { %p3880_p12 = pneg %p3879_p11 }
  0x85   : > { %p3887_p5 = pnand %p3886_p0, %p3880_p12 }
  0x87   : > { %3890 = shalt.err (!%p3887_p5)
}
  0x88   : > { %s4821_s18 = sld [smem:[#allocation40_spill]]  ;;  %s2850_s3 = sadd.s32 4294967294, %s4003_s21  }
  0x89   : > { %s4276_s28 = sadd.s32 1, %s4003_s21   ;;  %s47_s26 = sadd.s32 1, %s3999_s20 }
  0x8a   : > { %s44_s17 = ssub.s32 %s4003_s21, %s4276_s28  ;;  %p54_p7 = scmp.ne.s32.totalorder %s3999_s20, %s3995_s30 }
  0x8b   : > { %p45_p8 = scmp.eq.s32.totalorder %s44_s17, 0  ;;  %p55_p10 = scmp.eq.s32.totalorder %s4003_s21, 0 }
  0x8c   : > { %p60_p9 = scmp.ne.s32.totalorder %s3995_s30, %s3991_s0  ;;  %p462_p11 = scmp.eq.s32.totalorder %s4146_s2, 1 }
  0x8d   : > { %s4288_s15 = scalar_select %p45_p8, %s3999_s20, %s47_s26  }
  0x8e   : > { %3378 = dma.hbm_to_vmem [thread:$0]  (!%p4160_p6), %s4821_s18, 2048, %s619_s22, [#allocation18], %s4816_s19, %s4816_s19, %s4815_s25  }
  0x8f   : > { %4822 = sst [smem:[#allocation27_spill]] %s4288_s15  ;;  %p56_p12 = por %p55_p10, %p54_p7 }
  0x90   : > { %p4292_p13 = por %p4789_p1, %p60_p9  ;;  %p4296_p6 = por %p462_p11, %p54_p7 }
  0x91   : > { %p468_p2 = scmp.eq.s32.totalorder %s2850_s3, 1  ;;  %p3396_p0 = scmp.lt.s32.totalorder %s4003_s21, 2 }
  0x92   : > { %s4823_s8 = scalar_select %p4292_p13, 1, 0 }
  0x93   : > { %s4824_s25 = scalar_select %p4296_p6, 1, 0 }
  0x94   : > { %s632_s19 = sand.u32 1, %s3999_s20   ;;  %p4302_p5 = por %p468_p2, %p60_p9 }
  0x95   : > { %s2862_s27 = sshll.u32 %s632_s19, 6  ;;  %s3011_s1 = sshll.u32 %s4003_s21, 10 }
  0x96   : > { %s4825_s22 = scalar_select %p4302_p5, 1, 0 }
  0x97   : > { %s4826_s17 = sld [smem:[#allocation28_spill]]  ;;  %s636_s6 = scalar_lea.vmem [#allocation2], %s2862_s27 }
  0x98   : > { %s643_s10 = sshll.u32 %s636_s6, 4  ;;  %p4312_p7 = pnand %p3396_p0, %p56_p12  ;;  %s4316_s10 = int_to_ptr.vmem [resolvable:$true] %s643_s10 }
  0x99   : > { %s4318_s11 = scalar_lea.sflag [#allocation3], %s632_s19 }
  0x9a   : > { %p3893_p10 = pneg %p4312_p7 }
  0x9d   : > { %s4310_s24 = scalar_lea.hbm %s4826_s17, %s3011_s1  ;;  %s3896_s27 = scalar_lea.hbm %s4826_s17, 2048 }
  0x9e   : > { %s3891_s16 = scalar_lea.hbm %s4310_s24, 1024  ;;  %p3897_p12 = scmp.lt.s32.totalorder %s4310_s24, %s4826_s17 }
  0x9f   : > { %p3892_p8 = scmp.ne.s32.totalorder %s4310_s24, %s3891_s16  ;;  %p3898_p2 = scmp.lt.s32.totalorder %s3896_s27, %s3891_s16 }
  0xa1   : > { %p3894_p9 = pnand %p3893_p10, %p3892_p8  ;;  %p3899_p0 = por %p3898_p2, %p3897_p12 }
  0xa3   : > { %p3895_p11 = pneg %p3894_p9 }
  0xa5   : > { %p3900_p4 = pnand %p3899_p0, %p3895_p11 }
  0xa7   : > { %3903 = shalt.err (!%p3900_p4)
}
  0xa8   : > { %s3904_s19 = scalar_lea.vmem %s4316_s10, 1024  ;;  %s4018_s18 = smov [#allocation2]  }
  0xa9   : > { %p3905_p1 = scmp.ne.s32.totalorder %s4316_s10, %s3904_s19  ;;  %s3909_s15 = sshll.u32 %s4018_s18, 4  ;;  %s3910_s15 = int_to_ptr.vmem [resolvable:$false] %s3909_s15 }
  0xaa   : > { %s3911_s1 = scalar_lea.vmem %s3910_s15, 2048  ;;  %p3912_p9 = scmp.lt.s32.totalorder %s4316_s10, %s3910_s15 }
  0xab   : > { %p3907_p5 = pnand %p3905_p1, %p3893_p10  ;;  %p3913_p6 = scmp.lt.s32.totalorder %s3911_s1, %s3904_s19 }
  0xad   : > { %p3908_p8 = pneg %p3907_p5  ;;  %p3914_p13 = por %p3913_p6, %p3912_p9 }
  0xaf   : > { %p3915_p3 = pnand %p3914_p13, %p3908_p8 }
  0xb1   : > { %3918 = shalt.err (!%p3915_p3)
}
  0xb2   : > { %s4828_s16 = smov 8   ;;  %p4829_p1 = scmp.ne.s32.totalorder %s4807_s23, 0 }
  0xb3   : > { %3382 = dma.hbm_to_vmem [thread:$0]  (!%p4312_p7), %s4310_s24, 1024, %s4316_s10, %s4318_s11, %s4819_s14, %s4819_s14, %s4828_s16  }
  0xb4   : > { %655 = sbr.rel (%p4829_p1) target bundleno = 2367 (0x93f), region = 96  ;;  %s4345_s18 = sand.u32 (!%p4829_p1), 1, %s3995_s30  }
  0xb5   : > { %s2866_s15 = sshll.u32 (!%p4829_p1), %s4345_s18, 6  ;;  %s658_s29 = scalar_lea.sflag (!%p4829_p1), [#allocation3], %s4345_s18 }
  0xb6   : > { %s4351_s3 = scalar_lea.vmem (!%p4829_p1), [#allocation2], %s2866_s15  ;;  %p4830_p3 = scmp.ne.s32.totalorder (!%p4829_p1), %s4823_s8, 0 }
  0xb9   : > { %3962 = dma.done.wait (%p4830_p3), %s658_s29, 1024  }
  0xba   : > { %3964 = vsyncadd (%p4830_p3), %s658_s29, 4294966272  ;;  %p4831_p4 = scmp.eq.s32.totalorder %s4146_s2, 0 }
  0xbc   : > { %3966 = dma.done.wait (%p4831_p4), [#allocation6], 1280   ;;  %p4832_p13 = pmov %p4831_p4 }
  0xbd   : > { %p4833_p6 = pmov %p4831_p4 }
  0xbe   : > { %3968 = vsyncadd (%p4832_p13), [#allocation6], 4294966016 }
  0xbf   : > { %3970 = dma.done.wait (%p4833_p6), [#allocation9], 2048   ;;  %p4834_p5 = pmov %p4831_p4 }
  0xc0   : > { %p4835_p7 = pmov %p4831_p4 }
  0xc1   : > { %3972 = vsyncadd (%p4834_p5), [#allocation9], 4294965248 }
  0xc2   : > { %3974 = dma.done.wait (%p4835_p7), [#allocation12], 6144   ;;  %p4836_p10 = pmov %p4831_p4 }
  0xc3   : > { %p4837_p11 = pmov %p4831_p4 }
  0xc4   : > { %3976 = vsyncadd (%p4836_p10), [#allocation12], 4294961152 }
  0xc5   : > { %3978 = dma.done.wait (%p4837_p11), [#allocation15], 4096   ;;  %p4838_p12 = pmov %p4831_p4 }
  0xc6   : > { %p4839_p2 = pmov %p4831_p4 }
  0xc7   : > { %3980 = vsyncadd (%p4838_p12), [#allocation15], 4294963200 }
  0xc8   : > { %3982 = dma.done.wait (%p4839_p2), [#allocation18], 2048   ;;  %p4840_p0 = pmov %p4839_p2 }
  0xc9   : > { %v762_v0 = vld [vmem:[%s4351_s3 + $0x38] sm:$0xff]  ;;  %v760_v1 = vld [vmem:[%s4351_s3 + $0x28] sm:$0xff]  ;;  %v761_v2 = vld [vmem:[%s4351_s3 + $0x30] sm:$0xff]  ;;  %v4019_v44 = vmov 0.0   ;;  %vm4020_vm0 = vmmov 0   ;;  %vm1027_vm1 = vcmask 523264  }
  0xca   : > { %3984 = vsyncadd (%p4840_p0), [#allocation18], 4294965248  ;;  %777 = vadd.xlane.f32.xlu0 %v762_v0  ;;  %773 = vadd.xlane.f32.xlu1 %v760_v1  ;;  %v759_v3 = vld [vmem:[%s4351_s3 + $0x20] sm:$0xff]  ;;  %v758_v4 = vld [vmem:[%s4351_s3 + $0x18] sm:$0xff]  ;;  %vm1923_vm2 = vcmask 654336   ;;  %s4841_s10 = sld [smem:[#allocation36_spill]] }
  0xcb   : > { %v757_v5 = vld [vmem:[%s4351_s3 + $0x10] sm:$0xff]  ;;  %v756_v6 = vld [vmem:[%s4351_s3 + $0x8] sm:$0xff]  ;;  %v755_v7 = vld [vmem:[%s4351_s3] sm:$0xff]  ;;  %3201 = vmatprep.subr.mxu1 %v4019_v44  ;;  %3217 = vmatprep.mubr.msk.f32.mxu1 %vm4020_vm0, %v4019_v44  ;;  %s4842_s24 = sld [smem:[#allocation37_spill]]  ;;  %s4693_s6 = scalar_lea.vmem [#allocation19], %s2866_s15 }
  0xcc   : > { %v3457_v40 = vld [vmem:[#allocation10 + $0x38] sm:$0xff]   ;;  %v3458_v41 = vld [vmem:[#allocation10 + $0x30] sm:$0xff]   ;;  %v3459_v42 = vld [vmem:[#allocation10 + $0x28] sm:$0xff]   ;;  %s4843_s27 = sld [smem:[#allocation39_spill]]  ;;  %s2691_s15 = sshll.u32 %s4693_s6, 4  ;;  %s4709_s15 = int_to_ptr.vmem [resolvable:$true] %s2691_s15 }
  0xcd   : > { %3177 = vmatprep.subr.bf16.mxu0 %v3457_v40  ;;  %v3460_v43 = vld [vmem:[#allocation10 + $0x20] sm:$0xff]   ;;  %v3461_v45 = vld [vmem:[#allocation10 + $0x18] sm:$0xff]   ;;  %v3462_v46 = vld [vmem:[#allocation10 + $0x10] sm:$0xff]   ;;  %s3012_s26 = sshll.u32 %s4146_s2, 10  ;;  %s4844_s16 = sld [smem:[#allocation41_spill]] }
  0xce   : > { %775 = vadd.xlane.f32.xlu0 %v761_v2  ;;  %771 = vadd.xlane.f32.xlu1 %v759_v3  ;;  %v3463_v47 = vld [vmem:[#allocation10 + $0x8] sm:$0xff]   ;;  %v3464_v48 = vld [vmem:[#allocation10] sm:$0xff]   ;;  %v3467_v49 = vld [vmem:[#allocation11 + $0x74] ss:$8 sps:$4 sm:$0xff]   ;;  %p4845_p9 = scmp.ne.s32.totalorder %s4824_s25, 0  ;;  %s4022_s2 = smov [#allocation19]  }
  0xcf   : > { %3178 = vmatpush3.bf16.msra.mxu0 %v3457_v40  ;;  %s3923_s11 = sshll.u32 %s4022_s2, 4  ;;  %s3924_s11 = int_to_ptr.vmem [resolvable:$false] %s3923_s11 }
  0xd0   : > { %3179 = vmatprep.subr.bf16.mxu0 %v3458_v41  ;;  %s3925_s23 = scalar_lea.vmem %s3924_s11, 2048  ;;  %p3926_p4 = scmp.lt.s32.totalorder %s4709_s15, %s3924_s11 }
  0xd2   : > { %769 = vadd.xlane.f32.xlu0 %v758_v4  ;;  %767 = vadd.xlane.f32.xlu1 %v757_v5 }
  0xd3   : > { %3180 = vmatpush3.bf16.msra.mxu0 %v3458_v41  ;;  %s4715_s29 = scalar_lea.hbm %s4844_s16, %s3012_s26 }
  0xd4   : > { %3181 = vmatprep.subr.bf16.mxu0 %v3459_v42 }
  0xd6   : > { %765 = vadd.xlane.f32.xlu0 %v756_v6  ;;  %763 = vadd.xlane.f32.xlu1 %v755_v7 }
  0xd7   : > { %3182 = vmatpush3.bf16.msra.mxu0 %v3459_v42 }
  0xd8   : > { %3183 = vmatprep.subr.bf16.mxu0 %v3460_v43 }
  0xdb   : > { %3184 = vmatpush3.bf16.msra.mxu0 %v3460_v43 }
  0xdc   : > { %3185 = vmatprep.subr.bf16.mxu0 %v3461_v45 }
  0xdf   : > { %3186 = vmatpush3.bf16.msra.mxu0 %v3461_v45 }
  0xe0   : > { %3187 = vmatprep.subr.bf16.mxu0 %v3462_v46 }
  0xe3   : > { %3188 = vmatpush3.bf16.msra.mxu0 %v3462_v46  ;;  %v1022_v46 = vld [vmem:[#allocation5] sm:$0xff] }
  0xe4   : > { %3189 = vmatprep.subr.bf16.mxu0 %v3463_v47 }
  0xe7   : > { %3190 = vmatpush3.bf16.msra.mxu0 %v3463_v47 }
  0xe8   : > { %3191 = vmatprep.subr.bf16.mxu0 %v3464_v48 }
  0xeb   : > { %3192 = vmatpush3.bf16.msra.mxu0 %v3464_v48  ;;  %v3465_v48 = vld [vmem:[#allocation11 + $0x70] ss:$8 sps:$4 sm:$0xff]  }
  0xec   : > { %1453 = vmatprep.subr.bf16.mxu0 %v3467_v49 }
 0x153   : > { %v778_v8 = vpop.xlane.xlu0 %777  ;;  %v774_v9 = vpop.xlane.xlu1 %773 }
 0x154   : > { %v787_v10 = vmul.f32 0.0078125, %v778_v8  ;;  %v785_v11 = vmul.f32 0.0078125, %v774_v9 }
 0x156   : > { %v4385_v12 = vsub.f32 %v762_v0, %v787_v10  ;;  %v4387_v13 = vsub.f32 %v760_v1, %v785_v11  ;;  %v2877_v10 = vld [vmem:[%s4764_s4] ss:$0 sm:$0xff] }
 0x157   : > { %v776_v14 = vpop.xlane.xlu0 %775  ;;  %v772_v15 = vpop.xlane.xlu1 %771 }
 0x158   : > { %v786_v16 = vmul.f32 0.0078125, %v776_v14  ;;  %v803_v17 = vmul.f32 %v4385_v12, %v4385_v12  ;;  %v784_v18 = vmul.f32 0.0078125, %v772_v15  ;;  %v801_v21 = vmul.f32 %v4387_v13, %v4387_v13  ;;  %v2878_v15 = vld [vmem:[%s4765_s5] ss:$0 sm:$0xff] }
 0x15a   : > { %v4391_v19 = vsub.f32 %v761_v2, %v786_v16  ;;  %818 = vadd.xlane.f32.xlu0 %v803_v17  ;;  %v4393_v20 = vsub.f32 %v759_v3, %v784_v18 }
 0x15b   : > { %v770_v22 = vpop.xlane.xlu0 %769  ;;  %v768_v23 = vpop.xlane.xlu1 %767 }
 0x15c   : > { %v783_v24 = vmul.f32 0.0078125, %v770_v22  ;;  %v802_v25 = vmul.f32 %v4391_v19, %v4391_v19  ;;  %v782_v26 = vmul.f32 0.0078125, %v768_v23  ;;  %v800_v29 = vmul.f32 %v4393_v20, %v4393_v20 }
 0x15e   : > { %v4399_v27 = vsub.f32 %v758_v4, %v783_v24  ;;  %814 = vadd.xlane.f32.xlu0 %v801_v21  ;;  %816 = vadd.xlane.f32.xlu1 %v802_v25  ;;  %v4401_v28 = vsub.f32 %v757_v5, %v782_v26 }
 0x15f   : > { %v766_v30 = vpop.xlane.xlu0 %765  ;;  %v764_v31 = vpop.xlane.xlu1 %763 }
 0x160   : > { %v781_v32 = vmul.f32 0.0078125, %v766_v30  ;;  %v799_v33 = vmul.f32 %v4399_v27, %v4399_v27  ;;  %v780_v34 = vmul.f32 0.0078125, %v764_v31  ;;  %v798_v37 = vmul.f32 %v4401_v28, %v4401_v28 }
 0x162   : > { %v4407_v35 = vsub.f32 %v756_v6, %v781_v32  ;;  %810 = vadd.xlane.f32.xlu0 %v799_v33  ;;  %812 = vadd.xlane.f32.xlu1 %v800_v29  ;;  %v4409_v36 = vsub.f32 %v755_v7, %v780_v34 }
 0x164   : > { %v797_v38 = vmul.f32 %v4407_v35, %v4407_v35  ;;  %v796_v39 = vmul.f32 %v4409_v36, %v4409_v36 }
 0x166   : > { %806 = vadd.xlane.f32.xlu0 %v797_v38  ;;  %808 = vadd.xlane.f32.xlu1 %v798_v37 }
 0x16a   : > { %804 = vadd.xlane.f32.xlu1 %v796_v39 }
 0x1e3   : > { %v819_v50 = vpop.xlane.xlu0 %818 }
 0x1e4   : > { %v827_v51 = vmul.f32 0.0078125, %v819_v50  ;;  %v1023_v50 = vld [vmem:[#allocation5 + $0x8] sm:$0xff] }
 0x1e6   : > { %v835_v52 = vadd.f32 1e-06, %v827_v51  ;;  %v3470_v51 = vld [vmem:[#allocation11 + $0x64] ss:$8 sps:$4 sm:$0xff]  }
 0x1e7   : > { %v815_v53 = vpop.xlane.xlu0 %814  ;;  %v817_v54 = vpop.xlane.xlu1 %816 }
 0x1e8   : > { %3585 = vrsqrt.f32 %v835_v52  ;;  %v825_v55 = vmul.f32 0.0078125, %v815_v53  ;;  %v826_v56 = vmul.f32 0.0078125, %v817_v54  ;;  %v3468_v52 = vld [vmem:[#allocation11 + $0x60] ss:$8 sps:$4 sm:$0xff]  }
 0x1e9   : > { %v1024_v53 = vld [vmem:[#allocation5 + $0x10] sm:$0xff] }
 0x1ea   : > { %v833_v57 = vadd.f32 1e-06, %v825_v55  ;;  %v834_v58 = vadd.f32 1e-06, %v826_v56  ;;  %v3473_v55 = vld [vmem:[#allocation11 + $0x54] ss:$8 sps:$4 sm:$0xff]  }
 0x1eb   : > { %v811_v59 = vpop.xlane.xlu0 %810  ;;  %v813_v60 = vpop.xlane.xlu1 %812  ;;  %v1025_v56 = vld [vmem:[#allocation5 + $0x18] sm:$0xff] }
 0x1ec   : > { %3587 = vrsqrt.f32 %v833_v57  ;;  %v823_v61 = vmul.f32 0.0078125, %v811_v59  ;;  %v824_v62 = vmul.f32 0.0078125, %v813_v60  ;;  %v3471_v57 = vld [vmem:[#allocation11 + $0x50] ss:$8 sps:$4 sm:$0xff]   ;;  %v3474_v60 = vld [vmem:[#allocation11 + $0x40] ss:$8 sps:$4 sm:$0xff]  }
 0x1ed   : > { %3589 = vrsqrt.f32 %v834_v58  ;;  %v3476_v58 = vld [vmem:[#allocation11 + $0x44] ss:$8 sps:$4 sm:$0xff]   ;;  %v1026_v59 = vld [vmem:[#allocation5 + $0x20] sm:$0xff] }
 0x1ee   : > { %v831_v63 = vadd.f32 1e-06, %v823_v61  ;;  %v832_v0 = vadd.f32 1e-06, %v824_v62  ;;  %v3479_v61 = vld [vmem:[#allocation11 + $0x34] ss:$8 sps:$4 sm:$0xff]  }
 0x1ef   : > { %v807_v1 = vpop.xlane.xlu0 %806  ;;  %v809_v2 = vpop.xlane.xlu1 %808  ;;  %v1133_v62 = vld [vmem:[#allocation7] sm:$0xff] }
 0x1f0   : > { %3591 = vrsqrt.f32 %v831_v63  ;;  %v821_v3 = vmul.f32 0.0078125, %v807_v1  ;;  %v822_v4 = vmul.f32 0.0078125, %v809_v2  ;;  %v3477_v63 = vld [vmem:[#allocation11 + $0x30] ss:$8 sps:$4 sm:$0xff]   ;;  %v1134_v1 = vld [vmem:[#allocation7 + $0x8] sm:$0xff] }
 0x1f1   : > { %3593 = vrsqrt.f32 %v832_v0  ;;  %v3482_v0 = vld [vmem:[#allocation11 + $0x24] ss:$8 sps:$4 sm:$0xff]   ;;  %v3480_v2 = vld [vmem:[#allocation11 + $0x20] ss:$8 sps:$4 sm:$0xff]  }
 0x1f2   : > { %v829_v5 = vadd.f32 1e-06, %v821_v3  ;;  %v830_v6 = vadd.f32 1e-06, %v822_v4  ;;  %v3485_v3 = vld [vmem:[#allocation11 + $0x14] ss:$8 sps:$4 sm:$0xff]  }
 0x1f3   : > { %v805_v7 = vpop.xlane.xlu1 %804  ;;  %v1135_v4 = vld [vmem:[#allocation7 + $0x10] sm:$0xff] }
 0x1f4   : > { %3595 = vrsqrt.f32 %v829_v5  ;;  %v820_v8 = vmul.f32 0.0078125, %v805_v7  ;;  %v3483_v5 = vld [vmem:[#allocation11 + $0x10] ss:$8 sps:$4 sm:$0xff]  }
 0x1f5   : > { %v3586_v9 = vpop.eup %3585  ;;  %3597 = vrsqrt.f32 %v830_v6  ;;  %v3488_v6 = vld [vmem:[#allocation11 + $0x4] ss:$8 sps:$4 sm:$0xff]   ;;  %v1136_v7 = vld [vmem:[#allocation7 + $0x18] sm:$0xff] }
 0x1f6   : > { %v828_v11 = vadd.f32 1e-06, %v820_v8  ;;  %v851_v14 = vmul.f32 %v3586_v9, %v4385_v12  ;;  %v3486_v8 = vld [vmem:[#allocation11] ss:$8 sps:$4 sm:$0xff]   ;;  %v3491_v9 = vld [vmem:[#allocation11 + $0xf4] ss:$8 sps:$4 sm:$0xff]  }
 0x1f8   : > { %3599 = vrsqrt.f32 %v828_v11  ;;  %v866_v16 = vmul.f32 %v2877_v10, %v851_v14  ;;  %v3489_v11 = vld [vmem:[#allocation11 + $0xf0] ss:$8 sps:$4 sm:$0xff]   ;;  %v3494_v14 = vld [vmem:[#allocation11 + $0xe4] ss:$8 sps:$4 sm:$0xff]  }
 0x1f9   : > { %v3588_v17 = vpop.eup %3587 }
 0x1fa   : > { %v3590_v18 = vpop.eup %3589  ;;  %v4427_v21 = vadd.f32 %v2878_v15, %v866_v16  ;;  %v849_v22 = vmul.f32 %v3588_v17, %v4387_v13  ;;  %v3497_v16 = vld [vmem:[#allocation11 + $0xd4] ss:$8 sps:$4 sm:$0xff]   ;;  %v3495_v17 = vld [vmem:[#allocation11 + $0xd0] ss:$8 sps:$4 sm:$0xff]  }
 0x1fb   : > { %v850_v23 = vmul.f32 %v3590_v18, %v4391_v19  ;;  %v3500_v18 = vld [vmem:[#allocation11 + $0xc4] ss:$8 sps:$4 sm:$0xff]  }
 0x1fc   : > { %3202 = vmatpush3.msra.mxu1 %v4427_v21  ;;  %v864_v25 = vmul.f32 %v2877_v10, %v849_v22  ;;  %v3501_v22 = vld [vmem:[#allocation11 + $0xb0] ss:$8 sps:$4 sm:$0xff]  }
 0x1fd   : > { %v3592_v24 = vpop.eup %3591  ;;  %3203 = vmatprep.subr.mxu1 %v4019_v44  ;;  %v865_v12 = vmul.f32 %v2877_v10, %v850_v23  ;;  %v3506_v23 = vld [vmem:[#allocation11 + $0xa4] ss:$8 sps:$4 sm:$0xff]  }
 0x1fe   : > { %v3594_v26 = vpop.eup %3593  ;;  %v847_v29 = vmul.f32 %v3592_v24, %v4399_v27  ;;  %v879_v13 = vadd.f32 %v2878_v15, %v864_v25  ;;  %v3504_v24 = vld [vmem:[#allocation11 + $0xa0] ss:$8 sps:$4 sm:$0xff]   ;;  %v3507_v25 = vld [vmem:[#allocation11 + $0x90] ss:$8 sps:$4 sm:$0xff]  }
 0x1ff   : > { %v4434_v30 = vadd.f32 %v2878_v15, %v865_v12  ;;  %v848_v31 = vmul.f32 %v3594_v26, %v4393_v20  ;;  %v3509_v12 = vld [vmem:[#allocation11 + $0x94] ss:$8 sps:$4 sm:$0xff]   ;;  %v3512_v26 = vld [vmem:[#allocation11 + $0x84] ss:$8 sps:$4 sm:$0xff]  }
 0x200   : > { %v862_v19 = vmul.f32 %v2877_v10, %v847_v29  ;;  %v3510_v29 = vld [vmem:[#allocation11 + $0x80] ss:$8 sps:$4 sm:$0xff]  }
 0x201   : > { %v3596_v32 = vpop.eup %3595  ;;  %3204 = vmatpush3.msra.mxu1 %v4434_v30  ;;  %v863_v33 = vmul.f32 %v2877_v10, %v848_v31  ;;  %v885_v54 = vpack.c.bf16 %v4427_v21, %v4434_v30  ;;  %v3514_v31 = vld [vmem:[#allocation13 + $0x38] sm:$0xff]  }
 0x202   : > { %v3598_v34 = vpop.eup %3597  ;;  %3205 = vmatprep.subr.mxu1 %v4019_v44  ;;  %v845_v37 = vmul.f32 %v3596_v32, %v4407_v35  ;;  %v877_v20 = vadd.f32 %v2878_v15, %v862_v19  ;;  %v3515_v32 = vld [vmem:[#allocation13 + $0x70] sm:$0xff]   ;;  %v3518_v19 = vld [vmem:[#allocation13 + $0x28] sm:$0xff]  }
 0x203   : > { %3206 = vmatpush3.msra.mxu1 %v879_v13  ;;  %v878_v38 = vadd.f32 %v2878_v15, %v863_v33  ;;  %v846_v39 = vmul.f32 %v3598_v34, %v4401_v28  ;;  %v3517_v33 = vld [vmem:[#allocation13 + $0x68] sm:$0xff]   ;;  %v3519_v34 = vld [vmem:[#allocation13 + $0x60] sm:$0xff]  }
 0x204   : > { %3207 = vmatprep.subr.mxu1 %v4019_v44  ;;  %v860_v41 = vmul.f32 %v2877_v10, %v845_v37  ;;  %v3520_v37 = vld [vmem:[#allocation13 + $0x20] sm:$0xff]  }
 0x205   : > { %v3600_v27 = vpop.eup %3599  ;;  %3208 = vmatpush3.msra.mxu1 %v878_v38  ;;  %v861_v40 = vmul.f32 %v2877_v10, %v846_v39  ;;  %v884_v49 = vpack.c.bf16 %v879_v13, %v878_v38  ;;  %v3522_v39 = vld [vmem:[#allocation13 + $0x18] sm:$0xff]  }
 0x206   : > { %3209 = vmatprep.subr.mxu1 %v4019_v44  ;;  %v844_v42 = vmul.f32 %v3600_v27, %v4409_v36  ;;  %v875_v45 = vadd.f32 %v2878_v15, %v860_v41 }
 0x207   : > { %3210 = vmatpush3.msra.mxu1 %v877_v20  ;;  %v876_v43 = vadd.f32 %v2878_v15, %v861_v40 }
 0x208   : > { %3211 = vmatprep.subr.mxu1 %v4019_v44  ;;  %v859_v35 = vmul.f32 %v2877_v10, %v844_v42  ;;  %v1137_v10 = vld [vmem:[#allocation7 + $0x20] sm:$0xff] }
 0x209   : > { %3212 = vmatpush3.msra.mxu1 %v876_v43  ;;  %v883_v36 = vpack.c.bf16 %v877_v20, %v876_v43 }
 0x20a   : > { %3213 = vmatprep.subr.mxu1 %v4019_v44  ;;  %v874_v28 = vadd.f32 %v2878_v15, %v859_v35  ;;  %v3492_v15 = vld [vmem:[#allocation11 + $0xe0] ss:$8 sps:$4 sm:$0xff]  }
 0x20b   : > { %3214 = vmatpush3.msra.mxu1 %v875_v45 }
 0x20c   : > { %3215 = vmatprep.subr.mxu1 %v4019_v44  ;;  %v882_v47 = vpack.c.bf16 %v875_v45, %v874_v28 }
 0x20d   : > { %3216 = vmatpush3.msra.mxu1 %v874_v28 }
 0x20e   : > { %3218 = vmatmul.mubr.msk.f32.vlgmr.msra.gmra.mxu1 %vm1027_vm1, %v1022_v46  ;;  %3232 = vmatprep.subr.mxu1 %v4019_v44 }
 0x20f   : > { %3193 = vmatprep.mubr.bf16.mxu0 %v882_v47  ;;  %3233 = vmatpush3.msra.mxu1 %v4427_v21  ;;  %v3498_v21 = vld [vmem:[#allocation11 + $0xc0] ss:$8 sps:$4 sm:$0xff]  }
 0x210   : > { %3194 = vmatmul.mubr.bf16.vlgmr.msra.gmra.mxu0 %v883_v36  ;;  %3234 = vmatprep.subr.mxu1 %v4019_v44 }
 0x211   : > { %3197 = vmatprep.mubr.bf16.mxu0 %v884_v49  ;;  %3220 = vmatprep.mubr.msk.f32.mxu1 %vm4020_vm0, %v4019_v44 }
 0x212   : > { %3235 = vmatpush3.msra.mxu1 %v4434_v30  ;;  %1454 = vmatpush1.bf16.msra.mxu0 %v3465_v48  ;;  %v3513_v30 = vld [vmem:[#allocation13 + $0x78] sm:$0xff]  }
 0x213   : > { %3221 = vmatmul.mubr.msk.f32.gmra.mxu1 %vm1027_vm1, %v1023_v50  ;;  %3236 = vmatprep.subr.mxu1 %v4019_v44 }
 0x214   : > { %3237 = vmatpush3.msra.mxu1 %v879_v13  ;;  %3223 = vmatprep.mubr.msk.f32.mxu1 %vm4020_vm0, %v4019_v44  ;;  %v3516_v13 = vld [vmem:[#allocation13 + $0x30] sm:$0xff]  }
 0x215   : > { %3238 = vmatprep.subr.mxu1 %v4019_v44  ;;  %1455 = vmatprep.subr.bf16.mxu0 %v3470_v51 }
 0x216   : > { %3239 = vmatpush3.msra.mxu1 %v878_v38  ;;  %1456 = vmatpush1.bf16.msra.mxu0 %v3468_v52  ;;  %v3521_v38 = vld [vmem:[#allocation13 + $0x58] sm:$0xff]  }
 0x217   : > { %3224 = vmatmul.mubr.msk.f32.gmra.mxu1 %vm1027_vm1, %v1024_v53  ;;  %3240 = vmatprep.subr.mxu1 %v4019_v44 }
 0x218   : > { %3241 = vmatpush3.msra.mxu1 %v877_v20  ;;  %3198 = vmatmul.mubr.bf16.gmra.mxu0 %v885_v54 }
 0x219   : > { %3242 = vmatprep.subr.mxu1 %v4019_v44  ;;  %3226 = vmatprep.mubr.msk.f32.mxu1 %vm4020_vm0, %v4019_v44 }
 0x21a   : > { %3243 = vmatpush3.msra.mxu1 %v876_v43  ;;  %1457 = vmatprep.subr.bf16.mxu0 %v3473_v55 }
 0x21b   : > { %3227 = vmatmul.mubr.msk.f32.gmra.mxu1 %vm1027_vm1, %v1025_v56  ;;  %3244 = vmatprep.subr.mxu1 %v4019_v44 }
 0x21c   : > { %3245 = vmatpush3.msra.mxu1 %v875_v45  ;;  %3229 = vmatprep.mubr.msk.f32.mxu1 %vm4020_vm0, %v4019_v44 }
 0x21d   : > { %3246 = vmatprep.subr.mxu1 %v4019_v44  ;;  %1458 = vmatpush1.bf16.msra.mxu0 %v3471_v57 }
 0x21e   : > { %3247 = vmatpush3.msra.mxu1 %v874_v28  ;;  %1459 = vmatprep.subr.bf16.mxu0 %v3476_v58 }
 0x21f   : > { %3230 = vmatmul.mubr.msk.f32.gmra.mxu1 %vm1027_vm1, %v1026_v59  ;;  %3051 = vmatprep.subr.bf16.mxu1 %v3513_v30 }
 0x220   : > { %3248 = vmatprep.mubr.msk.f32.mxu1 %vm4020_vm0, %v4019_v44 }
 0x221   : > { %1460 = vmatpush1.bf16.msra.mxu0 %v3474_v60 }
 0x222   : > { %1461 = vmatprep.subr.bf16.mxu0 %v3479_v61 }
 0x223   : > { %3249 = vmatmul.mubr.msk.f32.vlgmr.msra.gmra.mxu1 %vm1027_vm1, %v1133_v62  ;;  %v3523_v62 = vld [vmem:[#allocation13 + $0x50] sm:$0xff]  }
 0x224   : > { %3251 = vmatprep.mubr.msk.f32.mxu1 %vm4020_vm0, %v4019_v44  ;;  %3052 = vmatpush3.bf16.msra.mxu1 %v3514_v31 }
 0x225   : > { %1462 = vmatpush1.bf16.msra.mxu0 %v3477_v63  ;;  %3053 = vmatprep.subr.bf16.mxu1 %v3515_v32  ;;  %v3524_v63 = vld [vmem:[#allocation13 + $0x10] sm:$0xff]  }
 0x226   : > { %1463 = vmatprep.subr.bf16.mxu0 %v3482_v0  ;;  %v3525_v0 = vld [vmem:[#allocation13 + $0x48] sm:$0xff]  }
 0x227   : > { %3252 = vmatmul.mubr.msk.f32.gmra.mxu1 %vm1027_vm1, %v1134_v1  ;;  %v3526_v1 = vld [vmem:[#allocation13 + $0x8] sm:$0xff]  }
 0x228   : > { %3254 = vmatprep.mubr.msk.f32.mxu1 %vm4020_vm0, %v4019_v44  ;;  %3054 = vmatpush3.bf16.msra.mxu1 %v3516_v13 }
 0x229   : > { %1464 = vmatpush1.bf16.msra.mxu0 %v3480_v2  ;;  %3055 = vmatprep.subr.bf16.mxu1 %v3517_v33  ;;  %v3527_v2 = vld [vmem:[#allocation13 + $0x40] sm:$0xff]  }
 0x22a   : > { %1465 = vmatprep.subr.bf16.mxu0 %v3485_v3  ;;  %v3528_v3 = vld [vmem:[#allocation13] sm:$0xff]  }
 0x22b   : > { %3255 = vmatmul.mubr.msk.f32.gmra.mxu1 %vm1027_vm1, %v1135_v4  ;;  %v3529_v4 = vld [vmem:[#allocation14 + $0x78] sm:$0xff]  }
 0x22c   : > { %3257 = vmatprep.mubr.msk.f32.mxu1 %vm4020_vm0, %v4019_v44  ;;  %3056 = vmatpush3.bf16.msra.mxu1 %v3518_v19 }
 0x22d   : > { %1466 = vmatpush1.bf16.msra.mxu0 %v3483_v5  ;;  %3057 = vmatprep.subr.bf16.mxu1 %v3519_v34 }
 0x22e   : > { %1467 = vmatprep.subr.bf16.mxu0 %v3488_v6 }
 0x22f   : > { %3258 = vmatmul.mubr.msk.f32.gmra.mxu1 %vm1027_vm1, %v1136_v7 }
 0x230   : > { %3260 = vmatprep.mubr.msk.f32.mxu1 %vm4020_vm0, %v4019_v44  ;;  %v3503_v44 = vld [vmem:[#allocation11 + $0xb4] ss:$8 sps:$4 sm:$0xff]   ;;  %3058 = vmatpush3.bf16.msra.mxu1 %v3520_v37 }
 0x231   : > { %1468 = vmatpush1.bf16.msra.mxu0 %v3486_v8  ;;  %3059 = vmatprep.subr.bf16.mxu1 %v3521_v38 }
 0x232   : > { %1469 = vmatprep.subr.bf16.mxu0 %v3491_v9 }
 0x233   : > { %3261 = vmatmul.mubr.msk.f32.gmra.mxu1 %vm1027_vm1, %v1137_v10 }
 0x234   : > { %3060 = vmatpush3.bf16.msra.mxu1 %v3522_v39  ;;  %v3530_v39 = vld [vmem:[#allocation14 + $0x38] sm:$0xff]  }
 0x235   : > { %1470 = vmatpush2.bf16.msra.mxu0 %v3489_v11  ;;  %3061 = vmatprep.subr.bf16.mxu1 %v3523_v62  ;;  %v1283_v11 = vlaneseq  ;;  %v3536_v62 = vld [vmem:[#allocation14 + $0x20] sm:$0xff]  }
 0x236   : > { %1471 = vmatprep.subr.bf16.mxu0 %v3494_v14 }
 0x238   : > { %3062 = vmatpush3.bf16.msra.mxu1 %v3524_v63 }
 0x239   : > { %1472 = vmatpush2.bf16.msra.mxu0 %v3492_v15  ;;  %3063 = vmatprep.subr.bf16.mxu1 %v3525_v0  ;;  %v4501_v15 = vshrl.u32 %v1283_v11, 7  ;;  %v3537_v0 = vld [vmem:[#allocation14 + $0x58] sm:$0xff]   ;;  %v3541_v11 = vld [vmem:[#allocation14 + $0x48] sm:$0xff]  }
 0x23a   : > { %1473 = vmatprep.subr.bf16.mxu0 %v3497_v16 }
 0x23b   : > { %v1289_v16 = vsub.s32 1, %v4501_v15 }
 0x23c   : > { %3064 = vmatpush3.bf16.msra.mxu1 %v3526_v1  ;;  %v3538_v1 = vld [vmem:[#allocation14 + $0x18] sm:$0xff]  }
 0x23d   : > { %1474 = vmatpush2.bf16.msra.mxu0 %v3495_v17  ;;  %3065 = vmatprep.subr.bf16.mxu1 %v3527_v2 }
 0x23e   : > { %1475 = vmatprep.subr.bf16.mxu0 %v3500_v18  ;;  %v1285_v18 = vsub.s32 0, %v4501_v15 }
 0x240   : > { %3066 = vmatpush3.bf16.msra.mxu1 %v3528_v3  ;;  %v3539_v3 = vld [vmem:[#allocation14 + $0x50] sm:$0xff]  }
 0x241   : > { %1476 = vmatpush2.bf16.msra.mxu0 %v3498_v21  ;;  %3085 = vmatprep.subr.bf16.mxu1 %v3529_v4  ;;  %v1281_v21 = vld [vmem:[%s4769_s9] sm:$0x3] }
 0x242   : > { %1477 = vmatprep.subr.bf16.mxu0 %v3503_v44  ;;  %v3540_v4 = vld [vmem:[#allocation14 + $0x10] sm:$0xff]  }
 0x245   : > { %1478 = vmatpush2.bf16.msra.mxu0 %v3501_v22  ;;  %v1290_v22 = vrot.slane %v1281_v21, %v1289_v16 }
 0x246   : > { %1479 = vmatprep.subr.bf16.mxu0 %v3506_v23  ;;  %v1286_v23 = vrot.slane %v1281_v21, %v1285_v18  ;;  %v3542_v21 = vld [vmem:[#allocation14 + $0x8] sm:$0xff]  }
 0x249   : > { %1480 = vmatpush2.bf16.msra.mxu0 %v3504_v24 }
 0x24a   : > { %1481 = vmatprep.subr.bf16.mxu0 %v3509_v12 }
 0x24d   : > { %1482 = vmatpush2.bf16.msra.mxu0 %v3507_v25 }
 0x24e   : > { %1483 = vmatprep.subr.bf16.mxu0 %v3512_v26 }
 0x251   : > { %1484 = vmatpush2.bf16.msra.mxu0 %v3510_v29 }
 0x2ce   : > { %v1109_v27 = vpop.f32.mrf.mxu1 }
 0x2d0   : > { %v3219_v20 = vpop.f32.mrf.mxu1  ;;  %v4487_v5 = vpop.f32.mrf.mxu0 }
 0x2d2   : > { %v4489_v6 = vpop.f32.mrf.mxu0 }
 0x2d3   : > { %v1114_v40 = vpop.f32.mrf.mxu1 }
 0x2d4   : > { %v1243_v50 = vpack.c.bf16 %v1114_v40, %v1109_v27  ;;  %v4491_v7 = vpop.f32.mrf.mxu0  ;;  %v3531_v40 = vld [vmem:[#allocation14 + $0x70] sm:$0xff]  }
 0x2d5   : > { %v3222_v41 = vpop.f32.mrf.mxu1 }
 0x2d6   : > { %v4493_v8 = vpop.f32.mrf.mxu0 }
 0x2d7   : > { %v1119_v42 = vpop.f32.mrf.mxu1 }
 0x2d8   : > { %v4495_v9 = vpop.f32.mrf.mxu0 }
 0x2d9   : > { %v3225_v43 = vpop.f32.mrf.mxu1 }
 0x2da   : > { %v4497_v10 = vpop.f32.mrf.mxu0 }
 0x2db   : > { %v1124_v35 = vpop.f32.mrf.mxu1 }
 0x2dc   : > { %v1245_v56 = vpack.c.bf16 %v1124_v35, %v1119_v42  ;;  %v4499_v14 = vpop.f32.mrf.mxu0 }
 0x2dd   : > { %v3228_v45 = vpop.f32.mrf.mxu1 }
 0x2de   : > { %v4504_v17 = vpop.f32.mrf.mxu0 }
 0x2df   : > { %v1129_v28 = vpop.f32.mrf.mxu1 }
 0x2e0   : > { %v1247_v61 = vpack.c.bf16 %v1129_v28, %v1129_v28  ;;  %v3532_v28 = vld [vmem:[#allocation14 + $0x30] sm:$0xff]  }
 0x2e1   : > { %v3231_v46 = vpop.f32.mrf.mxu1 }
 0x2e3   : > { %v1219_v47 = vpop.f32.mrf.mxu1 }
 0x2e5   : > { %v3250_v36 = vpop.f32.mrf.mxu1 }
 0x2e6   : > { %v3533_v36 = vld [vmem:[#allocation14 + $0x68] sm:$0xff]  }
 0x2e7   : > { %v1224_v48 = vpop.f32.mrf.mxu1 }
 0x2e8   : > { %v1244_v49 = vpack.c.bf16 %v1224_v48, %v1219_v47 }
 0x2e9   : > { %v3253_v51 = vpop.f32.mrf.mxu1 }
 0x2ea   : > { %1485 = vmatprep.mubr.bf16.mxu0 %v1244_v49 }
 0x2eb   : > { %v1229_v52 = vpop.f32.mrf.mxu1  ;;  %1486 = vmatmul.mubr.bf16.vlgmr.msra.gmra.mxu0 %v1243_v50 }
 0x2ed   : > { %v3256_v53 = vpop.f32.mrf.mxu1 }
 0x2ef   : > { %v1234_v54 = vpop.f32.mrf.mxu1 }
 0x2f0   : > { %v1246_v55 = vpack.c.bf16 %v1234_v54, %v1229_v52  ;;  %v3534_v54 = vld [vmem:[#allocation14 + $0x28] sm:$0xff]  }
 0x2f1   : > { %v3259_v57 = vpop.f32.mrf.mxu1 }
 0x2f2   : > { %1495 = vmatprep.mubr.bf16.mxu0 %v1246_v55 }
 0x2f3   : > { %1496 = vmatmul.mubr.bf16.gmra.mxu0 %v1245_v56  ;;  %v1239_v58 = vpop.f32.mrf.mxu1 }
 0x2f4   : > { %v1248_v59 = vpack.c.bf16 %v1239_v58, %v1239_v58  ;;  %v3535_v58 = vld [vmem:[#allocation14 + $0x60] sm:$0xff]  }
 0x2f5   : > { %v3262_v60 = vpop.f32.mrf.mxu1 }
 0x2f6   : > { %1505 = vmatprep.mubr.bf16.mxu0 %v1248_v59 }
 0x2fb   : > { %1506 = vmatmul.mubr.bf16.gmra.mxu0 %v1247_v61 }
 0x3ab   : > { %v1487_v44 = vpop.f32.mrf.mxu0 }
 0x3ac   : > { %v1488_v29 = vadd.f32 %v1487_v44, %v1286_v23  ;;  %v3543_v44 = vld [vmem:[#allocation14 + $0x40] sm:$0xff]  }
 0x3ad   : > { %v1489_v24 = vpop.f32.mrf.mxu0 }
 0x3ae   : > { %v1490_v25 = vadd.f32 %v1489_v24, %v1290_v22  ;;  %v1514_v34 = vmax.f32 %v1488_v29, 0.0 }
 0x3af   : > { %v1491_v12 = vpop.f32.mrf.mxu0 }
 0x3b0   : > { %v1492_v26 = vadd.f32 %v1491_v12, %v1286_v23  ;;  %v1515_v33 = vmax.f32 %v1490_v25, 0.0 }
 0x3b1   : > { %v1493_v30 = vpop.f32.mrf.mxu0 }
 0x3b2   : > { %v1494_v31 = vadd.f32 %v1493_v30, %v1290_v22  ;;  %v1516_v32 = vmax.f32 %v1492_v26, 0.0  ;;  %v2930_v26 = vld [vmem:[%s4772_s12] ss:$0 sm:$0xff] }
 0x3b3   : > { %v1497_v13 = vpop.f32.mrf.mxu0 }
 0x3b4   : > { %v1517_v19 = vmax.f32 %v1494_v31, 0.0  ;;  %v1524_v27 = vpack.c.bf16 %v1516_v32, %v1514_v34  ;;  %v1498_v43 = vadd.f32 %v1497_v13, %v1286_v23 }
 0x3b5   : > { %v1499_v37 = vpop.f32.mrf.mxu0 }
 0x3b6   : > { %v1525_v38 = vpack.c.bf16 %v1517_v19, %v1515_v33  ;;  %v1500_v41 = vadd.f32 %v1499_v37, %v1290_v22  ;;  %v1518_v50 = vmax.f32 %v1498_v43, 0.0 }
 0x3b7   : > { %v1501_v20 = vpop.f32.mrf.mxu0 }
 0x3b8   : > { %v1502_v42 = vadd.f32 %v1501_v20, %v1286_v23  ;;  %1697 = vmatprep.mubr.bf16.mxu1 %v1525_v38  ;;  %v1519_v48 = vmax.f32 %v1500_v41, 0.0 }
 0x3b9   : > { %v1503_v35 = vpop.f32.mrf.mxu0  ;;  %1698 = vmatmul.mubr.bf16.vlgmr.msra.gmra.mxu1 %v1524_v27 }
 0x3ba   : > { %v1504_v45 = vadd.f32 %v1503_v35, %v1290_v22  ;;  %3086 = vmatpush3.bf16.msra.mxu1 %v3530_v39  ;;  %v1520_v46 = vmax.f32 %v1502_v42, 0.0 }
 0x3bb   : > { %v1507_v47 = vpop.f32.mrf.mxu0  ;;  %3087 = vmatprep.subr.bf16.mxu1 %v3531_v40 }
 0x3bc   : > { %v1521_v49 = vmax.f32 %v1504_v45, 0.0  ;;  %v1526_v55 = vpack.c.bf16 %v1520_v46, %v1518_v50  ;;  %v1508_v56 = vadd.f32 %v1507_v47, %v1286_v23  ;;  %v1915_v47 = vld [vmem:[#allocation8] sm:$0xff] }
 0x3bd   : > { %v1509_v51 = vpop.f32.mrf.mxu0  ;;  %3283 = vmatprep.mubr.msk.f32.mxu0 %vm1923_vm2, %v1915_v47 }
 0x3be   : > { %v1527_v52 = vpack.c.bf16 %v1521_v49, %v1519_v48  ;;  %v1510_v53 = vadd.f32 %v1509_v51, %v1290_v22  ;;  %3088 = vmatpush3.bf16.msra.mxu1 %v3532_v28  ;;  %v1522_v63 = vmax.f32 %v1508_v56, 0.0  ;;  %v3544_v22 = vld [vmem:[#allocation14] sm:$0xff]  }
 0x3bf   : > { %v1511_v57 = vpop.f32.mrf.mxu0  ;;  %3089 = vmatprep.subr.bf16.mxu1 %v3533_v36 }
 0x3c0   : > { %v1523_v59 = vmax.f32 %v1510_v53, 0.0  ;;  %1705 = vmatprep.mubr.bf16.mxu1 %v1527_v52  ;;  %v1528_v2 = vpack.c.bf16 %v1522_v63, %v1522_v63 }
 0x3c1   : > { %v1512_v60 = vpop.f32.mrf.mxu0  ;;  %1706 = vmatmul.mubr.bf16.gmra.mxu1 %v1526_v55 }
 0x3c2   : > { %v1529_v61 = vpack.c.bf16 %v1523_v59, %v1523_v59  ;;  %3090 = vmatpush3.bf16.msra.mxu1 %v3534_v54  ;;  %v2947_v59 = vld [vmem:[%s4773_s13] ss:$0 sm:$0xff] }
 0x3c3   : > { %3091 = vmatprep.subr.bf16.mxu1 %v3535_v58 }
 0x3c4   : > { %1713 = vmatprep.mubr.bf16.mxu1 %v1529_v61 }
 0x3c6   : > { %3092 = vmatpush3.bf16.msra.mxu1 %v3536_v62 }
 0x3c7   : > { %3093 = vmatprep.subr.bf16.mxu1 %v3537_v0 }
 0x3c9   : > { %1714 = vmatmul.mubr.bf16.gmra.mxu1 %v1528_v2 }
 0x3ca   : > { %1891 = vmatprep.mubr.bf16.mxu1 %v1525_v38  ;;  %3094 = vmatpush3.bf16.msra.mxu1 %v3538_v1 }
 0x3cb   : > { %3095 = vmatprep.subr.bf16.mxu1 %v3539_v3 }
 0x3ce   : > { %3096 = vmatpush3.bf16.msra.mxu1 %v3540_v4 }
 0x3cf   : > { %3097 = vmatprep.subr.bf16.mxu1 %v3541_v11 }
 0x3d2   : > { %3098 = vmatpush3.bf16.msra.mxu1 %v3542_v21  ;;  %v1916_v21 = vld [vmem:[#allocation8 + $0x8] sm:$0xff] }
 0x3d3   : > { %3099 = vmatprep.subr.bf16.mxu1 %v3543_v44  ;;  %v1917_v44 = vld [vmem:[#allocation8 + $0x10] sm:$0xff] }
 0x3d6   : > { %3100 = vmatpush3.bf16.msra.mxu1 %v3544_v22  ;;  %v1918_v22 = vld [vmem:[#allocation8 + $0x18] sm:$0xff] }
 0x479   : > { %v3067_v23 = vpop.f32.mrf.mxu1 }
 0x47b   : > { %v3068_v24 = vpop.f32.mrf.mxu1 }
 0x47c   : > { %v3069_v25 = vadd.f32 %v3068_v24, %v3067_v23  ;;  %v1919_v23 = vld [vmem:[#allocation8 + $0x20] sm:$0xff]  ;;  %v1920_v24 = vld [vmem:[#allocation8 + $0x28] sm:$0xff] }
 0x47d   : > { %v3070_v12 = vpop.f32.mrf.mxu1 }
 0x47e   : > { %v4517_v32 = vadd.f32 %v3069_v25, %v2930_v26  ;;  %v1922_v25 = vld [vmem:[#allocation8 + $0x38] sm:$0xff] }
 0x47f   : > { %v3071_v29 = vpop.f32.mrf.mxu1 }
 0x480   : > { %v3072_v30 = vadd.f32 %v3071_v29, %v3070_v12  ;;  %v1921_v12 = vld [vmem:[#allocation8 + $0x30] sm:$0xff] }
 0x481   : > { %v3073_v31 = vpop.f32.mrf.mxu1 }
 0x482   : > { %v4519_v13 = vadd.f32 %v3072_v30, %v2930_v26 }
 0x483   : > { %v3074_v33 = vpop.f32.mrf.mxu1 }
 0x484   : > { %v1721_v19 = vpack.c.bf16 %v4519_v13, %v4517_v32  ;;  %v3075_v37 = vadd.f32 %v3074_v33, %v3073_v31  ;;  %v3649_v31 = vld [vmem:[%s4351_s3 + $0x8] sm:$0xff] }
 0x485   : > { %v3076_v34 = vpop.f32.mrf.mxu1 }
 0x486   : > { %1892 = vmatmul.mubr.bf16.vlgmr.msra.gmra.mxu1 %v1721_v19  ;;  %v1708_v20 = vadd.f32 %v3075_v37, %v2930_v26 }
 0x487   : > { %v3077_v38 = vpop.f32.mrf.mxu1  ;;  %1899 = vmatprep.mubr.bf16.mxu1 %v1527_v52 }
 0x488   : > { %v3078_v39 = vadd.f32 %v3077_v38, %v3076_v34  ;;  %v3650_v34 = vld [vmem:[%s4351_s3] sm:$0xff] }
 0x489   : > { %v3079_v27 = vpop.f32.mrf.mxu1 }
 0x48a   : > { %v1711_v40 = vadd.f32 %v3078_v39, %v2930_v26 }
 0x48b   : > { %v3080_v41 = vpop.f32.mrf.mxu1 }
 0x48c   : > { %v3081_v42 = vadd.f32 %v3080_v41, %v3079_v27  ;;  %v1722_v43 = vpack.c.bf16 %v1711_v40, %v1708_v20 }
 0x48d   : > { %v3082_v35 = vpop.f32.mrf.mxu1 }
 0x48e   : > { %1900 = vmatmul.mubr.bf16.gmra.mxu1 %v1722_v43  ;;  %v1716_v28 = vadd.f32 %v3081_v42, %v2930_v26  ;;  %v2879_v26 = vld [vmem:[%s4767_s7] ss:$0 sm:$0xff] }
 0x48f   : > { %v3083_v45 = vpop.f32.mrf.mxu1  ;;  %1907 = vmatprep.mubr.bf16.mxu1 %v1529_v61  ;;  %v995_v30 = vadd.f32 %v2879_v26, %v4493_v8  ;;  %v992_v33 = vadd.f32 %v2879_v26, %v4489_v6  ;;  %v1003_v39 = vadd.f32 %v4491_v7, %v2879_v26  ;;  %v1000_v41 = vadd.f32 %v4487_v5, %v2879_v26  ;;  %v3652_v6 = vld [vmem:[%s4351_s3 + $0x10] sm:$0xff] }
 0x490   : > { %v1723_v46 = vpack.c.bf16 %v1716_v28, %v1716_v28  ;;  %v1011_v7 = vadd.f32 %v2879_v26, %v4504_v17  ;;  %v1008_v5 = vadd.f32 %v2879_v26, %v4497_v10  ;;  %v3656_v10 = vld [vmem:[%s4351_s3 + $0x30] sm:$0xff] }
 0x496   : > { %1908 = vmatmul.mubr.bf16.gmra.mxu1 %v1723_v46 }
 0x546   : > { %v3101_v36 = vpop.f32.mrf.mxu1 }
 0x548   : > { %v3102_v48 = vpop.f32.mrf.mxu1 }
 0x549   : > { %v3103_v2 = vadd.f32 %v3102_v48, %v3101_v36  ;;  %v3654_v48 = vld [vmem:[%s4351_s3 + $0x20] sm:$0xff] }
 0x54a   : > { %v3104_v49 = vpop.f32.mrf.mxu1 }
 0x54b   : > { %v1894_v11 = vadd.f32 %v3103_v2, %v2947_v59 }
 0x54c   : > { %v3105_v50 = vpop.f32.mrf.mxu1 }
 0x54d   : > { %v3106_v0 = vadd.f32 %v3105_v50, %v3104_v49 }
 0x54e   : > { %v3107_v51 = vpop.f32.mrf.mxu1 }
 0x54f   : > { %v1897_v4 = vadd.f32 %v3106_v0, %v2947_v59 }
 0x550   : > { %v3108_v52 = vpop.f32.mrf.mxu1 }
 0x551   : > { %v3109_v61 = vadd.f32 %v3108_v52, %v3107_v51  ;;  %v1019_v51 = vadd.f32 %v4499_v14, %v2879_v26  ;;  %v3655_v52 = vld [vmem:[%s4351_s3 + $0x38] sm:$0xff]  ;;  %v3545_v14 = vld [vmem:[#allocation16 + $0x70] ss:$8 sps:$4 sm:$0xff]  }
 0x552   : > { %v3110_v53 = vpop.f32.mrf.mxu1 }
 0x553   : > { %v1902_v3 = vadd.f32 %v3109_v61, %v2947_v59 }
 0x554   : > { %v3111_v54 = vpop.f32.mrf.mxu1 }
 0x555   : > { %v3112_v57 = vadd.f32 %v3111_v54, %v3110_v53 }
 0x556   : > { %v3113_v55 = vpop.f32.mrf.mxu1 }
 0x557   : > { %v1905_v1 = vadd.f32 %v3112_v57, %v2947_v59 }
 0x558   : > { %v3114_v56 = vpop.f32.mrf.mxu1 }
 0x559   : > { %v3115_v58 = vadd.f32 %v3114_v56, %v3113_v55  ;;  %v1016_v55 = vadd.f32 %v4495_v9, %v2879_v26 }
 0x55a   : > { %v3116_v60 = vpop.f32.mrf.mxu1 }
 0x55b   : > { %v1910_v62 = vadd.f32 %v3115_v58, %v2947_v59  ;;  %v3547_v59 = vld [vmem:[#allocation16 + $0x74] ss:$8 sps:$4 sm:$0xff]  }
 0x55c   : > { %v3117_v63 = vpop.f32.mrf.mxu1  ;;  %2299 = vmatprep.subr.bf16.mxu1 %v3547_v59 }
 0x55d   : > { %3263 = vmatprep.subr.mxu0 %v1910_v62  ;;  %2300 = vmatpush1.bf16.msra.mxu1 %v3545_v14 }
 0x55e   : > { %3264 = vmatpush3.msra.mxu0 %v1910_v62 }
 0x55f   : > { %3265 = vmatprep.subr.mxu0 %v1905_v1 }
 0x560   : > { %3266 = vmatpush3.msra.mxu0 %v1905_v1 }
 0x561   : > { %3267 = vmatprep.subr.mxu0 %v1902_v3 }
 0x562   : > { %3268 = vmatpush3.msra.mxu0 %v1902_v3 }
 0x563   : > { %3269 = vmatprep.subr.mxu0 %v1897_v4 }
 0x564   : > { %3270 = vmatpush3.msra.mxu0 %v1897_v4 }
 0x565   : > { %3271 = vmatprep.subr.mxu0 %v1894_v11 }
 0x566   : > { %3272 = vmatpush3.msra.mxu0 %v1894_v11 }
 0x567   : > { %3273 = vmatprep.subr.mxu0 %v1716_v28 }
 0x568   : > { %3274 = vmatpush3.msra.mxu0 %v1716_v28  ;;  %v3653_v28 = vld [vmem:[%s4351_s3 + $0x28] sm:$0xff] }
 0x569   : > { %3275 = vmatprep.subr.mxu0 %v1711_v40 }
 0x56a   : > { %3276 = vmatpush3.msra.mxu0 %v1711_v40 }
 0x56b   : > { %3277 = vmatprep.subr.mxu0 %v1708_v20 }
 0x56c   : > { %3278 = vmatpush3.msra.mxu0 %v1708_v20  ;;  %v3651_v20 = vld [vmem:[%s4351_s3 + $0x18] sm:$0xff]  ;;  %s2678_s3 = scalar_lea.sflag [#allocation4], %s4345_s18 }
 0x56d   : > { %3279 = vmatprep.subr.mxu0 %v4519_v13 }
 0x56e   : > { %3280 = vmatpush3.msra.mxu0 %v4519_v13 }
 0x56f   : > { %3281 = vmatprep.subr.mxu0 %v4517_v32 }
 0x570   : > { %3282 = vmatpush3.msra.mxu0 %v4517_v32 }
 0x571   : > { %3284 = vmatmul.mubr.msk.f32.vlgmr.msra.gmra.mxu0 %vm1923_vm2, %v1916_v21 }
 0x572   : > { %3286 = vmatprep.mubr.msk.f32.mxu0 %vm1923_vm2, %v1917_v44 }
 0x575   : > { %3287 = vmatmul.mubr.msk.f32.gmra.mxu0 %vm1923_vm2, %v1918_v22 }
 0x576   : > { %3289 = vmatprep.mubr.msk.f32.mxu0 %vm1923_vm2, %v1919_v23 }
 0x579   : > { %3290 = vmatmul.mubr.msk.f32.gmra.mxu0 %vm1923_vm2, %v1920_v24 }
 0x57a   : > { %3292 = vmatprep.mubr.msk.f32.mxu0 %vm1923_vm2, %v1921_v12 }
 0x57d   : > { %3293 = vmatmul.mubr.msk.f32.gmra.mxu0 %vm1923_vm2, %v1922_v25 }
 0x631   : > { %v3285_v29 = vpop.f32.mrf.mxu0 }
 0x632   : > { %v2054_v32 = vadd.f32 %v3649_v31, %v3285_v29 }
 0x633   : > { %v2014_v13 = vpop.f32.mrf.mxu0 }
 0x634   : > { %v4544_v19 = vadd.f32 %v2054_v32, %v995_v30  ;;  %v2053_v37 = vadd.f32 %v3650_v34, %v2014_v13 }
 0x635   : > { %v3288_v38 = vpop.f32.mrf.mxu0 }
 0x636   : > { %v4548_v27 = vadd.f32 %v2053_v37, %v992_v33  ;;  %v2056_v40 = vadd.f32 %v3651_v20, %v3288_v38  ;;  %2071 = vadd.xlane.f32.xlu1 %v4544_v19  ;;  %v3550_v20 = vld [vmem:[#allocation16 + $0x64] ss:$8 sps:$4 sm:$0xff]  }
 0x637   : > { %v2024_v8 = vpop.f32.mrf.mxu0  ;;  %2301 = vmatprep.subr.bf16.mxu1 %v3550_v20 }
 0x638   : > { %v4553_v42 = vadd.f32 %v2056_v40, %v1003_v39  ;;  %v2055_v43 = vadd.f32 %v3652_v6, %v2024_v8  ;;  %2069 = vadd.xlane.f32.xlu0 %v4548_v27  ;;  %v3548_v40 = vld [vmem:[#allocation16 + $0x60] ss:$8 sps:$4 sm:$0xff]  }
 0x639   : > { %v3291_v35 = vpop.f32.mrf.mxu0  ;;  %2302 = vmatpush1.bf16.msra.mxu1 %v3548_v40 }
 0x63a   : > { %v4558_v45 = vadd.f32 %v2055_v43, %v1000_v41  ;;  %v2058_v46 = vadd.f32 %v3653_v28, %v3291_v35  ;;  %2075 = vadd.xlane.f32.xlu1 %v4553_v42  ;;  %v3553_v43 = vld [vmem:[#allocation16 + $0x54] ss:$8 sps:$4 sm:$0xff]   ;;  %v3551_v35 = vld [vmem:[#allocation16 + $0x50] ss:$8 sps:$4 sm:$0xff]   ;;  %v3554_v28 = vld [vmem:[#allocation16 + $0x40] ss:$8 sps:$4 sm:$0xff]  }
 0x63b   : > { %v2034_v47 = vpop.f32.mrf.mxu0  ;;  %2303 = vmatprep.subr.bf16.mxu1 %v3553_v43 }
 0x63c   : > { %v4563_v36 = vadd.f32 %v2058_v46, %v1011_v7  ;;  %v2057_v49 = vadd.f32 %v3654_v48, %v2034_v47  ;;  %2073 = vadd.xlane.f32.xlu0 %v4558_v45  ;;  %v3556_v7 = vld [vmem:[#allocation16 + $0x44] ss:$8 sps:$4 sm:$0xff]   ;;  %v3559_v46 = vld [vmem:[#allocation16 + $0x34] ss:$8 sps:$4 sm:$0xff]   ;;  %v3557_v47 = vld [vmem:[#allocation16 + $0x30] ss:$8 sps:$4 sm:$0xff]  }
 0x63d   : > { %v3294_v50 = vpop.f32.mrf.mxu0  ;;  %2304 = vmatpush1.bf16.msra.mxu1 %v3551_v35  ;;  %v3560_v48 = vld [vmem:[#allocation16 + $0x20] ss:$8 sps:$4 sm:$0xff]  }
 0x63e   : > { %v4568_v17 = vadd.f32 %v2057_v49, %v1008_v5  ;;  %v2060_v53 = vadd.f32 %v3655_v52, %v3294_v50  ;;  %2079 = vadd.xlane.f32.xlu1 %v4563_v36  ;;  %2305 = vmatprep.subr.bf16.mxu1 %v3556_v7  ;;  %v3562_v5 = vld [vmem:[#allocation16 + $0x24] ss:$8 sps:$4 sm:$0xff]   ;;  %v3565_v49 = vld [vmem:[#allocation16 + $0x14] ss:$8 sps:$4 sm:$0xff]   ;;  %v3563_v50 = vld [vmem:[#allocation16 + $0x10] ss:$8 sps:$4 sm:$0xff]  }
 0x63f   : > { %v2044_v54 = vpop.f32.mrf.mxu0  ;;  %v3566_v52 = vld [vmem:[#allocation16] ss:$8 sps:$4 sm:$0xff]  }
 0x640   : > { %v4573_v56 = vadd.f32 %v2060_v53, %v1019_v51  ;;  %v2059_v57 = vadd.f32 %v3656_v10, %v2044_v54  ;;  %2077 = vadd.xlane.f32.xlu0 %v4568_v17  ;;  %v3568_v51 = vld [vmem:[#allocation16 + $0x4] ss:$8 sps:$4 sm:$0xff]   ;;  %v4021_v53 = vmov 0  }
 0x641   : > { %2306 = vmatpush1.bf16.msra.mxu1 %v3554_v28  ;;  %2331 = vmatprep.mubr.bf16.mxu1 %v4021_v53 }
 0x642   : > { %v4577_v58 = vadd.f32 %v2059_v57, %v1016_v55  ;;  %2083 = vadd.xlane.f32.xlu1 %v4573_v56  ;;  %2307 = vmatprep.subr.bf16.mxu1 %v3559_v46 }
 0x644   : > { %2081 = vadd.xlane.f32.xlu0 %v4577_v58 }
 0x645   : > { %2308 = vmatpush1.bf16.msra.mxu1 %v3557_v47 }
 0x646   : > { %2309 = vmatprep.subr.bf16.mxu1 %v3562_v5 }
 0x649   : > { %2310 = vmatpush1.bf16.msra.mxu1 %v3560_v48 }
 0x64a   : > { %2311 = vmatprep.subr.bf16.mxu1 %v3565_v49 }
 0x64d   : > { %2312 = vmatpush1.bf16.msra.mxu1 %v3563_v50 }
 0x64e   : > { %2313 = vmatprep.subr.bf16.mxu1 %v3568_v51 }
 0x651   : > { %2314 = vmatpush1.bf16.msra.mxu1 %v3566_v52 }
 0x6bf   : > { %v2072_v60 = vpop.xlane.xlu1 %2071 }
 0x6c0   : > { %v2086_v61 = vmul.f32 0.0078125, %v2072_v60 }
 0x6c1   : > { %v2070_v62 = vpop.xlane.xlu0 %2069 }
 0x6c2   : > { %v4582_v9 = vsub.f32 %v4544_v19, %v2086_v61  ;;  %v2085_v63 = vmul.f32 0.0078125, %v2070_v62 }
 0x6c3   : > { %v2076_v0 = vpop.xlane.xlu1 %2075 }
 0x6c4   : > { %v4585_v1 = vsub.f32 %v4548_v27, %v2085_v63  ;;  %v2088_v2 = vmul.f32 0.0078125, %v2076_v0  ;;  %v2102_v3 = vmul.f32 %v4582_v9, %v4582_v9 }
 0x6c5   : > { %v2074_v4 = vpop.xlane.xlu0 %2073 }
 0x6c6   : > { %v4590_v11 = vsub.f32 %v4553_v42, %v2088_v2  ;;  %v2087_v21 = vmul.f32 0.0078125, %v2074_v4  ;;  %2111 = vadd.xlane.f32.xlu1 %v2102_v3  ;;  %v2101_v44 = vmul.f32 %v4585_v1, %v4585_v1 }
 0x6c7   : > { %v2080_v22 = vpop.xlane.xlu1 %2079 }
 0x6c8   : > { %v4595_v23 = vsub.f32 %v4558_v45, %v2087_v21  ;;  %v2090_v24 = vmul.f32 0.0078125, %v2080_v22  ;;  %2109 = vadd.xlane.f32.xlu0 %v2101_v44  ;;  %v2104_v12 = vmul.f32 %v4590_v11, %v4590_v11 }
 0x6c9   : > { %v2078_v25 = vpop.xlane.xlu0 %2077 }
 0x6ca   : > { %v4600_v26 = vsub.f32 %v4563_v36, %v2090_v24  ;;  %v2089_v29 = vmul.f32 0.0078125, %v2078_v25  ;;  %2115 = vadd.xlane.f32.xlu1 %v2104_v12  ;;  %v2103_v30 = vmul.f32 %v4595_v23, %v4595_v23 }
 0x6cb   : > { %v2084_v31 = vpop.xlane.xlu1 %2083 }
 0x6cc   : > { %v4605_v32 = vsub.f32 %v4568_v17, %v2089_v29  ;;  %v2092_v13 = vmul.f32 0.0078125, %v2084_v31  ;;  %2113 = vadd.xlane.f32.xlu0 %v2103_v30  ;;  %v2106_v33 = vmul.f32 %v4600_v26, %v4600_v26 }
 0x6cd   : > { %v2082_v34 = vpop.xlane.xlu0 %2081 }
 0x6ce   : > { %v4610_v37 = vsub.f32 %v4573_v56, %v2092_v13  ;;  %v2091_v38 = vmul.f32 0.0078125, %v2082_v34  ;;  %2119 = vadd.xlane.f32.xlu1 %v2106_v33  ;;  %v2105_v39 = vmul.f32 %v4605_v32, %v4605_v32  ;;  %v2972_v13 = vld [vmem:[%s4841_s10] ss:$0 sm:$0xff]  ;;  %s3919_s10 = scalar_lea.vmem %s4709_s15, 1024 }
 0x6cf   : > { %p3920_p8 = scmp.ne.s32.totalorder %s4709_s15, %s3919_s10  ;;  %p3927_p13 = scmp.lt.s32.totalorder %s3925_s23, %s3919_s10 }
 0x6d0   : > { %v4615_v8 = vsub.f32 %v4577_v58, %v2091_v38  ;;  %2117 = vadd.xlane.f32.xlu0 %v2105_v39  ;;  %v2108_v41 = vmul.f32 %v4610_v37, %v4610_v37 }
 0x6d1   : > { %p3921_p1 = pnand %p3920_p8, %p4845_p9  ;;  %p3928_p6 = por %p3927_p13, %p3926_p4 }
 0x6d2   : > { %2123 = vadd.xlane.f32.xlu1 %v2108_v41  ;;  %v2107_v6 = vmul.f32 %v4615_v8, %v4615_v8 }
 0x6d3   : > { %p3922_p3 = pneg %p3921_p1 }
 0x6d4   : > { %2121 = vadd.xlane.f32.xlu0 %v2107_v6  ;;  %v2973_v6 = vld [vmem:[%s4842_s24] ss:$0 sm:$0xff] }
 0x6d5   : > { %p3929_p5 = pnand %p3928_p6, %p3922_p3 }
 0x74f   : > { %v2112_v54 = vpop.xlane.xlu1 %2111 }
 0x750   : > { %v2126_v55 = vmul.f32 0.0078125, %v2112_v54 }
 0x751   : > { %v2110_v10 = vpop.xlane.xlu0 %2109 }
 0x752   : > { %v2134_v57 = vadd.f32 1e-06, %v2126_v55  ;;  %v2125_v14 = vmul.f32 0.0078125, %v2110_v10 }
 0x753   : > { %v2116_v59 = vpop.xlane.xlu1 %2115 }
 0x754   : > { %3601 = vrsqrt.f32 %v2134_v57  ;;  %v2133_v60 = vadd.f32 1e-06, %v2125_v14  ;;  %v2128_v61 = vmul.f32 0.0078125, %v2116_v59 }
 0x755   : > { %v2114_v62 = vpop.xlane.xlu0 %2113 }
 0x756   : > { %3603 = vrsqrt.f32 %v2133_v60  ;;  %v2136_v63 = vadd.f32 1e-06, %v2128_v61  ;;  %v2127_v0 = vmul.f32 0.0078125, %v2114_v62 }
 0x757   : > { %v2120_v2 = vpop.xlane.xlu1 %2119 }
 0x758   : > { %3605 = vrsqrt.f32 %v2136_v63  ;;  %v2135_v3 = vadd.f32 1e-06, %v2127_v0  ;;  %v2130_v4 = vmul.f32 0.0078125, %v2120_v2 }
 0x759   : > { %v2118_v21 = vpop.xlane.xlu0 %2117 }
 0x75a   : > { %3607 = vrsqrt.f32 %v2135_v3  ;;  %v2129_v44 = vmul.f32 0.0078125, %v2118_v21  ;;  %v2138_v22 = vadd.f32 1e-06, %v2130_v4  ;;  %v3569_v3 = vld [vmem:[#allocation17 + $0x78] sm:$0xff]   ;;  %v3572_v21 = vld [vmem:[#allocation17 + $0x30] sm:$0xff]  }
 0x75b   : > { %v2124_v12 = vpop.xlane.xlu1 %2123  ;;  %v3570_v4 = vld [vmem:[#allocation17 + $0x38] sm:$0xff]   ;;  %3137 = vmatprep.subr.bf16.mxu0 %v3569_v3  ;;  %3295 = vmatprep.subr.bf16.mxu1 %v3569_v3 }
 0x75c   : > { %v2137_v24 = vadd.f32 1e-06, %v2129_v44  ;;  %v2132_v30 = vmul.f32 0.0078125, %v2124_v12  ;;  %3138 = vmatpush3.bf16.msra.mxu0 %v3570_v4  ;;  %v3574_v44 = vld [vmem:[#allocation17 + $0x28] sm:$0xff]   ;;  %v3578_v12 = vld [vmem:[#allocation17 + $0x18] sm:$0xff]  }
 0x75d   : > { %v2122_v25 = vpop.xlane.xlu0 %2121 }
 0x75e   : > { %3609 = vrsqrt.f32 %v2137_v24  ;;  %v2131_v29 = vmul.f32 0.0078125, %v2122_v25  ;;  %v2140_v39 = vadd.f32 1e-06, %v2132_v30  ;;  %v3577_v24 = vld [vmem:[#allocation17 + $0x58] sm:$0xff]   ;;  %v3579_v25 = vld [vmem:[#allocation17 + $0x50] sm:$0xff]   ;;  %v3581_v30 = vld [vmem:[#allocation17 + $0x48] sm:$0xff]  }
 0x75f   : > { %3611 = vrsqrt.f32 %v2138_v22  ;;  %v3576_v22 = vld [vmem:[#allocation17 + $0x20] sm:$0xff]  }
 0x760   : > { %v2139_v34 = vadd.f32 1e-06, %v2131_v29  ;;  %v3580_v29 = vld [vmem:[#allocation17 + $0x10] sm:$0xff]  }
 0x761   : > { %v3602_v31 = vpop.eup %3601 }
 0x762   : > { %v2150_v33 = vmul.f32 %v3602_v31, %v4582_v9  ;;  %3613 = vrsqrt.f32 %v2139_v34  ;;  %v3582_v31 = vld [vmem:[#allocation17 + $0x8] sm:$0xff]   ;;  %v2207_v34 = vld [vmem:[%s4843_s27] sm:$0x3] }
 0x763   : > { %v3604_v38 = vpop.eup %3603  ;;  %3615 = vrsqrt.f32 %v2140_v39  ;;  %v4648_v39 = vrot.slane %v2207_v34, %v1289_v16 }
 0x764   : > { %v2149_v20 = vmul.f32 %v3604_v38, %v4585_v1  ;;  %v2165_v40 = vmul.f32 %v2972_v13, %v2150_v33  ;;  %v3584_v33 = vld [vmem:[#allocation17] sm:$0xff]   ;;  %v4644_v38 = vrot.slane %v2207_v34, %v1285_v18 }
 0x765   : > { %v3606_v41 = vpop.eup %3605 }
 0x766   : > { %v2164_v43 = vmul.f32 %v2972_v13, %v2149_v20  ;;  %v2180_v28 = vadd.f32 %v2973_v6, %v2165_v40  ;;  %v2152_v9 = vmul.f32 %v3606_v41, %v4590_v11 }
 0x767   : > { %v3608_v35 = vpop.eup %3607 }
 0x768   : > { %v2179_v7 = vadd.f32 %v2973_v6, %v2164_v43  ;;  %v2151_v46 = vmul.f32 %v3608_v35, %v4595_v23  ;;  %v2167_v1 = vmul.f32 %v2972_v13, %v2152_v9 }
 0x76a   : > { %v2187_v47 = vpack.c.bf16 %v2180_v28, %v2179_v7  ;;  %v2166_v5 = vmul.f32 %v2972_v13, %v2151_v46  ;;  %v2182_v52 = vadd.f32 %v2973_v6, %v2167_v1 }
 0x76b   : > { %v3610_v48 = vpop.eup %3609 }
 0x76c   : > { %2332 = vmatmul.mubr.bf16.vlgmr.msra.gmra.mxu1 %v2187_v47  ;;  %v3612_v49 = vpop.eup %3611  ;;  %v2181_v50 = vadd.f32 %v2973_v6, %v2166_v5  ;;  %v2153_v51 = vmul.f32 %v3610_v48, %v4605_v32 }
 0x76d   : > { %2341 = vmatprep.mubr.bf16.mxu1 %v4021_v53  ;;  %v2154_v54 = vmul.f32 %v3612_v49, %v4600_v26  ;;  %3303 = vmatpush3.bf16.msra.mxu1 %v3570_v4 }
 0x76e   : > { %v2188_v55 = vpack.c.bf16 %v2182_v52, %v2181_v50  ;;  %v2168_v10 = vmul.f32 %v2972_v13, %v2153_v51 }
 0x76f   : > { %v3614_v57 = vpop.eup %3613  ;;  %v2169_v11 = vmul.f32 %v2972_v13, %v2154_v54 }
 0x770   : > { %v3616_v23 = vpop.eup %3615  ;;  %v2183_v14 = vadd.f32 %v2973_v6, %v2168_v10  ;;  %v2155_v59 = vmul.f32 %v3614_v57, %v4615_v8  ;;  %v3571_v8 = vld [vmem:[#allocation17 + $0x70] sm:$0xff]  }
 0x771   : > { %v2184_v60 = vadd.f32 %v2973_v6, %v2169_v11  ;;  %v2156_v61 = vmul.f32 %v3616_v23, %v4610_v37  ;;  %3139 = vmatprep.subr.bf16.mxu0 %v3571_v8  ;;  %3296 = vmatprep.subr.bf16.mxu1 %v3571_v8  ;;  %v3573_v37 = vld [vmem:[#allocation17 + $0x68] sm:$0xff]  }
 0x772   : > { %v2170_v63 = vmul.f32 %v2972_v13, %v2155_v59  ;;  %3140 = vmatpush3.bf16.msra.mxu0 %v3572_v21  ;;  %3304 = vmatpush3.bf16.msra.mxu1 %v3572_v21 }
 0x773   : > { %v2189_v62 = vpack.c.bf16 %v2184_v60, %v2183_v14  ;;  %v2171_v32 = vmul.f32 %v2972_v13, %v2156_v61  ;;  %3141 = vmatprep.subr.bf16.mxu0 %v3573_v37  ;;  %3297 = vmatprep.subr.bf16.mxu1 %v3573_v37  ;;  %v3583_v13 = vld [vmem:[#allocation17 + $0x40] sm:$0xff]  }
 0x774   : > { %2342 = vmatmul.mubr.bf16.gmra.mxu1 %v2188_v55  ;;  %v2185_v26 = vadd.f32 %v2973_v6, %v2170_v63 }
 0x775   : > { %2351 = vmatprep.mubr.bf16.mxu1 %v4021_v53  ;;  %v2186_v0 = vadd.f32 %v2973_v6, %v2171_v32 }
 0x776   : > { %3142 = vmatpush3.bf16.msra.mxu0 %v3574_v44  ;;  %3305 = vmatpush3.bf16.msra.mxu1 %v3574_v44 }
 0x777   : > { %v2190_v2 = vpack.c.bf16 %v2186_v0, %v2185_v26 }
 0x77c   : > { %2352 = vmatmul.mubr.bf16.gmra.mxu1 %v2189_v62 }
 0x77d   : > { %2361 = vmatprep.mubr.bf16.mxu1 %v4021_v53  ;;  %v3575_v53 = vld [vmem:[#allocation17 + $0x60] sm:$0xff]  }
 0x77e   : > { %3143 = vmatprep.subr.bf16.mxu0 %v3575_v53  ;;  %3298 = vmatprep.subr.bf16.mxu1 %v3575_v53 }
 0x77f   : > { %3144 = vmatpush3.bf16.msra.mxu0 %v3576_v22  ;;  %3306 = vmatpush3.bf16.msra.mxu1 %v3576_v22 }
 0x780   : > { %3145 = vmatprep.subr.bf16.mxu0 %v3577_v24  ;;  %3299 = vmatprep.subr.bf16.mxu1 %v3577_v24 }
 0x783   : > { %3146 = vmatpush3.bf16.msra.mxu0 %v3578_v12  ;;  %3307 = vmatpush3.bf16.msra.mxu1 %v3578_v12 }
 0x784   : > { %2362 = vmatmul.mubr.bf16.gmra.mxu1 %v2190_v2  ;;  %3147 = vmatprep.subr.bf16.mxu0 %v3579_v25 }
 0x785   : > { %3300 = vmatprep.subr.bf16.mxu1 %v3579_v25 }
 0x787   : > { %3148 = vmatpush3.bf16.msra.mxu0 %v3580_v29  ;;  %3308 = vmatpush3.bf16.msra.mxu1 %v3580_v29 }
 0x788   : > { %3149 = vmatprep.subr.bf16.mxu0 %v3581_v30  ;;  %3301 = vmatprep.subr.bf16.mxu1 %v3581_v30 }
 0x78b   : > { %3150 = vmatpush3.bf16.msra.mxu0 %v3582_v31  ;;  %3309 = vmatpush3.bf16.msra.mxu1 %v3582_v31 }
 0x78c   : > { %3151 = vmatprep.subr.bf16.mxu0 %v3583_v13  ;;  %3302 = vmatprep.subr.bf16.mxu1 %v3583_v13 }
 0x78f   : > { %3152 = vmatpush3.bf16.msra.mxu0 %v3584_v33  ;;  %3310 = vmatpush3.bf16.msra.mxu1 %v3584_v33 }
 0x82c   : > { %v2333_v20 = vpop.f32.mrf.mxu1 }
 0x82d   : > { %v2334_v40 = vadd.f32 %v2333_v20, %v4644_v38 }
 0x82e   : > { %v2335_v41 = vpop.f32.mrf.mxu1 }
 0x82f   : > { %v2336_v6 = vadd.f32 %v2335_v41, %v4648_v39  ;;  %v2388_v43 = vmul.f32 0.70710677, %v2334_v40  ;;  %v2372_v29 = vmul.f32 0.5, %v2334_v40 }
 0x830   : > { %v2337_v35 = vpop.f32.mrf.mxu1 }
 0x831   : > { %v2389_v7 = vmul.f32 0.70710677, %v2336_v6  ;;  %v2338_v28 = vadd.f32 %v2337_v35, %v4644_v38  ;;  %v2373_v26 = vmul.f32 0.5, %v2336_v6 }
 0x832   : > { %v2339_v46 = vpop.f32.mrf.mxu1 }
 0x833   : > { %3617 = verf.f32 %v2389_v7  ;;  %v2390_v9 = vmul.f32 0.70710677, %v2338_v28  ;;  %v2340_v18 = vadd.f32 %v2339_v46, %v4648_v39  ;;  %v2374_v44 = vmul.f32 0.5, %v2338_v28 }
 0x834   : > { %3619 = verf.f32 %v2388_v43  ;;  %v2343_v15 = vpop.f32.mrf.mxu1 }
 0x835   : > { %3621 = verf.f32 %v2390_v9  ;;  %v2391_v16 = vmul.f32 0.70710677, %v2340_v18  ;;  %v4655_v47 = vadd.f32 %v2343_v15, %v4644_v38  ;;  %v2375_v24 = vmul.f32 0.5, %v2340_v18 }
 0x836   : > { %v2345_v5 = vpop.f32.mrf.mxu1 }
 0x837   : > { %3623 = verf.f32 %v2391_v16  ;;  %v4658_v48 = vadd.f32 %v2345_v5, %v4648_v39  ;;  %v2392_v1 = vmul.f32 0.70710677, %v4655_v47 }
 0x838   : > { %v2347_v49 = vpop.f32.mrf.mxu1 }
 0x839   : > { %v2393_v50 = vmul.f32 0.70710677, %v4658_v48  ;;  %v2348_v51 = vadd.f32 %v2347_v49, %v4644_v38 }
 0x83a   : > { %v2349_v52 = vpop.f32.mrf.mxu1 }
 0x83b   : > { %3625 = verf.f32 %v2393_v50  ;;  %v2394_v54 = vmul.f32 0.70710677, %v2348_v51  ;;  %v2350_v55 = vadd.f32 %v2349_v52, %v4648_v39  ;;  %v2378_v52 = vmul.f32 0.5, %v2348_v51 }
 0x83c   : > { %3627 = verf.f32 %v2392_v1  ;;  %v2353_v10 = vpop.f32.mrf.mxu1 }
 0x83d   : > { %3629 = verf.f32 %v2394_v54  ;;  %v2395_v57 = vmul.f32 0.70710677, %v2350_v55  ;;  %v4665_v23 = vadd.f32 %v2353_v10, %v4644_v38  ;;  %v2377_v10 = vmul.f32 0.5, %v4658_v48 }
 0x83e   : > { %v2355_v11 = vpop.f32.mrf.mxu1 }
 0x83f   : > { %3631 = verf.f32 %v2395_v57  ;;  %v2396_v14 = vmul.f32 0.70710677, %v4665_v23  ;;  %v4669_v60 = vadd.f32 %v2355_v11, %v4648_v39  ;;  %v2376_v11 = vmul.f32 0.5, %v4655_v47 }
 0x840   : > { %v3618_v59 = vpop.eup %3617  ;;  %v2357_v61 = vpop.f32.mrf.mxu1 }
 0x841   : > { %v3620_v62 = vpop.eup %3619  ;;  %v4672_v63 = vadd.f32 %v2357_v61, %v4644_v38  ;;  %v2397_v0 = vmul.f32 0.70710677, %v4669_v60  ;;  %v2421_v3 = vadd.f32 1.0, %v3618_v59  ;;  %3633 = verf.f32 %v2396_v14 }
 0x842   : > { %v3622_v32 = vpop.eup %3621  ;;  %v2359_v2 = vpop.f32.mrf.mxu1  ;;  %v2420_v37 = vadd.f32 1.0, %v3620_v62  ;;  %v2381_v47 = vmul.f32 0.5, %v4669_v60 }
 0x843   : > { %v2422_v4 = vadd.f32 1.0, %v3622_v32  ;;  %v2398_v8 = vmul.f32 0.70710677, %v4672_v63  ;;  %3635 = verf.f32 %v2397_v0  ;;  %v2360_v53 = vadd.f32 %v2359_v2, %v4648_v39 }
 0x844   : > { %v3624_v21 = vpop.eup %3623  ;;  %v2363_v22 = vpop.f32.mrf.mxu1  ;;  %v2437_v33 = vmul.f32 %v2421_v3, %v2373_v26  ;;  %v2436_v41 = vmul.f32 %v2420_v37, %v2372_v29 }
 0x845   : > { %v2423_v12 = vadd.f32 1.0, %v3624_v21  ;;  %3637 = verf.f32 %v2398_v8  ;;  %v4678_v25 = vadd.f32 %v2363_v22, %v4644_v38  ;;  %v2438_v30 = vmul.f32 %v2422_v4, %v2374_v44 }
 0x846   : > { %v2399_v31 = vmul.f32 0.70710677, %v2360_v53  ;;  %v2365_v13 = vpop.f32.mrf.mxu1  ;;  %v2382_v8 = vmul.f32 0.5, %v4672_v63  ;;  %v2383_v21 = vmul.f32 0.5, %v2360_v53  ;;  %v2380_v44 = vmul.f32 0.5, %v4665_v23 }
 0x847   : > { %v2439_v34 = vmul.f32 %v2423_v12, %v2375_v24  ;;  %v2400_v6 = vmul.f32 0.70710677, %v4678_v25  ;;  %v2366_v43 = vadd.f32 %v2365_v13, %v4648_v39  ;;  %v2452_v18 = vpack.c.bf16 %v2438_v30, %v2436_v41 }
 0x848   : > { %v3626_v20 = vpop.eup %3625  ;;  %3639 = verf.f32 %v2399_v31  ;;  %v2367_v35 = vpop.f32.mrf.mxu1  ;;  %v2384_v23 = vmul.f32 0.5, %v4678_v25 }
 0x849   : > { %v3628_v7 = vpop.eup %3627  ;;  %v2368_v28 = vadd.f32 %v2367_v35, %v4644_v38  ;;  %v2453_v46 = vpack.c.bf16 %v2439_v34, %v2437_v33  ;;  %v2401_v40 = vmul.f32 0.70710677, %v2366_v43  ;;  %v2425_v16 = vadd.f32 1.0, %v3626_v20 }
 0x84a   : > { %v3630_v9 = vpop.eup %3629  ;;  %v2369_v15 = vpop.f32.mrf.mxu1  ;;  %3641 = verf.f32 %v2400_v6  ;;  %v2424_v50 = vadd.f32 1.0, %v3628_v7  ;;  %v2379_v38 = vmul.f32 0.5, %v2350_v55  ;;  %v2385_v60 = vmul.f32 0.5, %v2366_v43 }
 0x84b   : > { %v2426_v5 = vadd.f32 1.0, %v3630_v9  ;;  %v2402_v1 = vmul.f32 0.70710677, %v2368_v28  ;;  %2620 = vmatprep.mubr.bf16.mxu0 %v2453_v46  ;;  %3643 = verf.f32 %v2401_v40  ;;  %v2370_v54 = vadd.f32 %v2369_v15, %v4648_v39 }
 0x84c   : > { %v3632_v49 = vpop.eup %3631  ;;  %2621 = vmatmul.mubr.bf16.vlgmr.msra.gmra.mxu0 %v2452_v18  ;;  %v2441_v61 = vmul.f32 %v2425_v16, %v2377_v10  ;;  %v2440_v26 = vmul.f32 %v2424_v50, %v2376_v11  ;;  %v2386_v35 = vmul.f32 0.5, %v2368_v28 }
 0x84d   : > { %v2427_v57 = vadd.f32 1.0, %v3632_v49  ;;  %3645 = verf.f32 %v2402_v1  ;;  %v2442_v14 = vmul.f32 %v2426_v5, %v2378_v52  ;;  %v2403_v59 = vmul.f32 0.70710677, %v2370_v54 }
 0x84e   : > { %v3634_v32 = vpop.eup %3633  ;;  %v2387_v53 = vmul.f32 0.5, %v2370_v54 }
 0x84f   : > { %v2443_v62 = vmul.f32 %v2427_v57, %v2379_v38  ;;  %3647 = verf.f32 %v2403_v59  ;;  %v2454_v3 = vpack.c.bf16 %v2442_v14, %v2440_v26  ;;  %v2428_v55 = vadd.f32 1.0, %v3634_v32 }
 0x850   : > { %v3636_v0 = vpop.eup %3635 }
 0x851   : > { %v2455_v51 = vpack.c.bf16 %v2443_v62, %v2441_v61  ;;  %v2429_v4 = vadd.f32 1.0, %v3636_v0  ;;  %v2444_v31 = vmul.f32 %v2428_v55, %v2380_v44 }
 0x852   : > { %v3638_v2 = vpop.eup %3637 }
 0x853   : > { %v2430_v39 = vadd.f32 1.0, %v3638_v2  ;;  %2628 = vmatprep.mubr.bf16.mxu0 %v2455_v51  ;;  %v2445_v12 = vmul.f32 %v2429_v4, %v2381_v47 }
 0x854   : > { %2629 = vmatmul.mubr.bf16.gmra.mxu0 %v2454_v3 }
 0x855   : > { %v3640_v48 = vpop.eup %3639  ;;  %v2446_v22 = vmul.f32 %v2430_v39, %v2382_v8 }
 0x856   : > { %v2431_v37 = vadd.f32 1.0, %v3640_v48 }
 0x857   : > { %v3642_v24 = vpop.eup %3641  ;;  %v2456_v20 = vpack.c.bf16 %v2446_v22, %v2444_v31 }
 0x858   : > { %v2447_v29 = vmul.f32 %v2431_v37, %v2383_v21  ;;  %v3644_v30 = vpop.eup %3643  ;;  %v2432_v63 = vadd.f32 1.0, %v3642_v24 }
 0x859   : > { %v2433_v41 = vadd.f32 1.0, %v3644_v30 }
 0x85a   : > { %v3646_v13 = vpop.eup %3645  ;;  %v2457_v33 = vpack.c.bf16 %v2447_v29, %v2445_v12  ;;  %v2448_v40 = vmul.f32 %v2432_v63, %v2384_v23 }
 0x85b   : > { %v2434_v34 = vadd.f32 1.0, %v3646_v13  ;;  %v2449_v9 = vmul.f32 %v2433_v41, %v2385_v60 }
 0x85c   : > { %2636 = vmatprep.mubr.bf16.mxu0 %v2457_v33  ;;  %v3648_v6 = vpop.eup %3647 }
 0x85d   : > { %2637 = vmatmul.mubr.bf16.gmra.mxu0 %v2456_v20  ;;  %v2435_v7 = vadd.f32 1.0, %v3648_v6  ;;  %v2450_v46 = vmul.f32 %v2434_v34, %v2386_v35 }
 0x85f   : > { %v2451_v18 = vmul.f32 %v2435_v7, %v2387_v53  ;;  %v2458_v16 = vpack.c.bf16 %v2450_v46, %v2448_v40 }
 0x861   : > { %v2459_v15 = vpack.c.bf16 %v2451_v18, %v2449_v9 }
 0x863   : > { %2644 = vmatprep.mubr.bf16.mxu1 %v2459_v15 }
 0x864   : > { %2645 = vmatmul.mubr.bf16.vlgmr.msra.gmra.mxu1 %v2458_v16 }
 0x90c   : > { %v3153_v5 = vpop.f32.mrf.mxu0 }
 0x90e   : > { %v3154_v1 = vpop.f32.mrf.mxu0 }
 0x90f   : > { %v3155_v49 = vadd.f32 %v3154_v1, %v3153_v5 }
 0x910   : > { %v3156_v50 = vpop.f32.mrf.mxu0 }
 0x911   : > { %v2653_v28 = vmul.f32 0.5, %v3155_v49 }
 0x912   : > { %v3157_v52 = vpop.f32.mrf.mxu0 }
 0x913   : > { %v2661_v43 = vadd.f32 %v2653_v28, %v4548_v27  ;;  %v3158_v54 = vadd.f32 %v3157_v52, %v3156_v50 }
 0x914   : > { %v3159_v10 = vpop.f32.mrf.mxu0 }
 0x915   : > { %2669 = vst [vmem:[%s4693_s6] sm:$0xff] %v2661_v43  ;;  %v2654_v25 = vmul.f32 0.5, %v3158_v54 }
 0x916   : > { %v3160_v38 = vpop.f32.mrf.mxu0 }
 0x917   : > { %v2662_v57 = vadd.f32 %v2654_v25, %v4544_v19  ;;  %v3161_v11 = vadd.f32 %v3160_v38, %v3159_v10 }
 0x918   : > { %v3162_v14 = vpop.f32.mrf.mxu0 }
 0x919   : > { %2670 = vst [vmem:[%s4693_s6 + $0x8] sm:$0xff] %v2662_v57  ;;  %v2655_v59 = vmul.f32 0.5, %v3161_v11 }
 0x91a   : > { %v3163_v61 = vpop.f32.mrf.mxu0 }
 0x91b   : > { %v2663_v27 = vadd.f32 %v2655_v59, %v4558_v45  ;;  %v3164_v62 = vadd.f32 %v3163_v61, %v3162_v14 }
 0x91d   : > { %2671 = vst [vmem:[%s4693_s6 + $0x10] sm:$0xff] %v2663_v27  ;;  %v2656_v32 = vmul.f32 0.5, %v3164_v62  ;;  %v3165_v26 = vpop.f32.mrf.mxu0 }
 0x91f   : > { %v2664_v0 = vadd.f32 %v2656_v32, %v4553_v42  ;;  %v3166_v51 = vpop.f32.mrf.mxu0 }
 0x920   : > { %v3167_v2 = vadd.f32 %v3166_v51, %v3165_v26 }
 0x921   : > { %2672 = vst [vmem:[%s4693_s6 + $0x18] sm:$0xff] %v2664_v0  ;;  %v3168_v19 = vpop.f32.mrf.mxu0 }
 0x922   : > { %v2657_v3 = vmul.f32 0.5, %v3167_v2 }
 0x923   : > { %v3169_v39 = vpop.f32.mrf.mxu0 }
 0x924   : > { %v2665_v4 = vadd.f32 %v2657_v3, %v4568_v17  ;;  %v3170_v48 = vadd.f32 %v3169_v39, %v3168_v19  ;;  %v3171_v45 = vpop.f32.mrf.mxu1 }
 0x926   : > { %2673 = vst [vmem:[%s4693_s6 + $0x20] sm:$0xff] %v2665_v4  ;;  %v2658_v55 = vmul.f32 0.5, %v3170_v48  ;;  %v3172_v8 = vpop.f32.mrf.mxu1 }
 0x927   : > { %v3173_v47 = vadd.f32 %v3172_v8, %v3171_v45 }
 0x928   : > { %v2666_v42 = vadd.f32 %v2658_v55, %v4563_v36  ;;  %v3174_v21 = vpop.f32.mrf.mxu1 }
 0x929   : > { %v2659_v37 = vmul.f32 0.5, %v3173_v47 }
 0x92a   : > { %2674 = vst [vmem:[%s4693_s6 + $0x28] sm:$0xff] %v2666_v42  ;;  %v3175_v44 = vpop.f32.mrf.mxu1 }
 0x92b   : > { %v2667_v22 = vadd.f32 %v2659_v37, %v4577_v58  ;;  %v3176_v17 = vadd.f32 %v3175_v44, %v3174_v21 }
 0x92d   : > { %2675 = vst [vmem:[%s4693_s6 + $0x30] sm:$0xff] %v2667_v22  ;;  %v2660_v24 = vmul.f32 0.5, %v3176_v17 }
 0x92f   : > { %v2668_v36 = vadd.f32 %v2660_v24, %v4573_v56 }
 0x931   : > { %2676 = vst [vmem:[%s4693_s6 + $0x38] sm:$0xff] %v2668_v36 }
 0x932   : > { %3932 = shalt.err (!%p3929_p5)
}
 0x933   : > { %s3933_s24 = scalar_lea.hbm %s4715_s29, 1024  ;;  %s3937_s27 = scalar_lea.hbm %s4844_s16, 2048 }
 0x934   : > { %p3934_p7 = scmp.ne.s32.totalorder %s4715_s29, %s3933_s24  ;;  %p3938_p12 = scmp.lt.s32.totalorder %s4715_s29, %s4844_s16 }
 0x935   : > { %p3939_p2 = scmp.lt.s32.totalorder %s3937_s27, %s3933_s24 }
 0x936   : > { %p3935_p10 = pnand %p3934_p7, %p4845_p9 }
 0x937   : > { %p3940_p0 = por %p3939_p2, %p3938_p12 }
 0x938   : > { %p3936_p11 = pneg %p3935_p10 }
 0x93a   : > { %p3941_p8 = pnand %p3940_p0, %p3936_p11 }
 0x93c   : > { %3944 = shalt.err (!%p3941_p8)
}
 0x93d   : > { %s4023_s19 = smov 128   ;;  %s4024_s1 = smov 8  }
 0x93e   : > { %3349 = dma.vmem_to_hbm [thread:$0]  (%p4845_p9), %s4709_s15, 1024, %s4715_s29, %s2678_s3, %s4023_s19, %s4023_s19, %s4024_s1  }
 0x93f PF: > { %s2706_s10 = sand.u32 1, %s3991_s0   ;;  %p4846_p1 = scmp.ne.s32.totalorder %s4825_s22, 0 }
 0x940   : > { %p4847_p3 = scmp.ge.s32.totalorder %s4003_s21, 2  ;;  %s2707_s2 = scalar_lea.sflag [#allocation4], %s2706_s10 }
 0x942   : > { %p3384_p4 = pnand %p4847_p3, %p4846_p1 }
 0x944   : > { %p3385_p13 = pneg %p3384_p4 }
 0x946   : > { %3986 = dma.done.wait (%p3385_p13), %s2707_s2, 1024  }
 0x947   : > { %3988 = vsyncadd (%p3385_p13), %s2707_s2, 4294966272  ;;  %s4848_s11 = sld [smem:[#allocation27_spill]]  ;;  %p37_p6 = scmp.ge.s32.totalorder %s4276_s28, 4  }
 0x948   : > { %s4849_s0 = smov %s3995_s30  ;;  %s4850_s30 = smov %s3999_s20 }
 0x949   : > { %s4852_s21 = smov %s4276_s28  ;;  %39 = sbr.rel (!%p37_p6) target bundleno = 25 (0x19), region = 177 }
 0x94d   : > { %s4851_s20 = smov %s4848_s11 }
 0x94e   :  { %2712 = vsyncpa [#allocation3], 1 }
 0x94f   :  { %2714 = vsyncpa [#allocation3 + $0x1], 1 }
 0x950   :  { %2715 = vsyncpa [#allocation6], 1 }
 0x951   :  { %2716 = vsyncpa [#allocation9], 1 }
 0x952   :  { %2717 = vsyncpa [#allocation12], 1 }
 0x953   :  { %2718 = vsyncpa [#allocation15], 1 }
 0x954   :  { %2719 = vsyncpa [#allocation18], 1 }
 0x955   :  { %2720 = vsyncpa [#allocation4], 1 }
 0x956   :  { %2722 = vsyncpa [#allocation4 + $0x1], 1 }

</bundles_post_ra>
